<compile_context>
chip_gen: v7x
topology: tpu7x:2x2x1
jax: 0.10.0
libtpu: 0.0.40
codegen_flags: <defaults>
</compile_context>

<pallas_src>
import functools

import jax
import jax.numpy as jnp
from jax.experimental import pallas as pl
from jax.experimental.pallas import tpu as pltpu

EPS = 1e-5
D_IN, D_H0, D_H1, D_OUT = 768, 512, 128, 6
OUT_PAD = 8        # narrow full-extent last dim of the HBM output (>= D_OUT)
W2_PAD = 128       # lane-dense padded width of the final weight (clean MXU tile)


def _round_up(x, m):
    return ((x + m - 1) // m) * m


def _vmem_capacity_bytes(default=64 << 20):
    """Physical VMEM per core; conservative fallback if the query is unavailable."""
    try:
        cap = getattr(pltpu.get_tpu_info(), "vmem_capacity_bytes", None)
        if cap:
            return int(cap)
    except Exception:
        pass
    return default


def _toxicity_kernel(
    # inputs
    x_ref,                      # (TB, 768) f32/bf16 batch tile (read in phase 0)
    w0_ref, w1_ref, w2_ref,     # bf16 weights, VMEM-resident across the grid
    b2_ref,                     # (1, OUT_PAD) f32
    g0_ref, be0_ref,            # (1, 512) f32  BN0 gamma/beta
    g1_ref, be1_ref,            # (1, 128) f32  BN1 gamma/beta
    # outputs
    o_ref,                      # (TB, OUT_PAD) f32 tile (written in phase 2)
    # scratch (persists across the whole grid)
    h0_ref,                     # (B_pad, 512) f32/bf16 full-batch hidden 0
    h1_ref,                     # (B_pad, 128) f32/bf16 full-batch hidden 1
    s0_ref,                     # (2, 512) f32 [sum, sum_sq] for BN0
    s1_ref,                     # (2, 128) f32 [sum, sum_sq] for BN1
    *,
    tile_b: int,
    batch: int,                 # true (unpadded) batch size, static
):
    phase = pl.program_id(0)
    t = pl.program_id(1)
    last_t = pl.num_programs(1) - 1
    row_start = pl.multiple_of(t * tile_b, tile_b)
    inv_n = jnp.float32(1.0 / batch)

    @pl.when(jnp.logical_and(phase == 0, t == 0))
    def _init():
        s0_ref[...] = jnp.zeros_like(s0_ref)
        s1_ref[...] = jnp.zeros_like(s1_ref)

    @pl.when(phase == 0)
    def _phase0():
        # linear0 (bias dropped: cancelled exactly by the batch-mean subtraction).
        h0 = jnp.dot(x_ref[...].astype(jnp.bfloat16), w0_ref[...],
                     preferred_element_type=jnp.float32)            # (TB, 512)
        h0_ref[pl.ds(row_start, tile_b), :] = h0.astype(h0_ref.dtype)
        # Padded x rows are exactly zero (zero input, no bias) -> no row mask.
        s0_ref[0:1, :] += jnp.sum(h0, axis=0, keepdims=True)
        s0_ref[1:2, :] += jnp.sum(h0 * h0, axis=0, keepdims=True)

    @pl.when(phase == 1)
    def _phase1():
        # Fold BN0 affine into a single per-feature scale/shift (tiny (1,512) work).
        mean0 = s0_ref[0:1, :] * inv_n
        var0 = s0_ref[1:2, :] * inv_n - mean0 * mean0               # biased var
        scale0 = jax.lax.rsqrt(var0 + EPS) * g0_ref[...]
        shift0 = be0_ref[...] - mean0 * scale0
        h0 = h0_ref[pl.ds(row_start, tile_b), :].astype(jnp.float32)
        a0 = jnp.maximum(h0 * scale0 + shift0, 0.0)
        # linear1 (bias dropped for the same reason as above).
        h1 = jnp.dot(a0.astype(jnp.bfloat16), w1_ref[...],
                     preferred_element_type=jnp.float32)            # (TB, 128)
        h1_ref[pl.ds(row_start, tile_b), :] = h1.astype(h1_ref.dtype)

        @pl.when(t != last_t)
        def _acc_unmasked():                 # interior tiles have no pad rows
            s1_ref[0:1, :] += jnp.sum(h1, axis=0, keepdims=True)
            s1_ref[1:2, :] += jnp.sum(h1 * h1, axis=0, keepdims=True)

        @pl.when(t == last_t)
        def _acc_masked():                   # only the last tile can hold pad rows
            row_ids = t * tile_b + jax.lax.broadcasted_iota(
                jnp.int32, (tile_b, 1), 0)
            hm = jnp.where(row_ids < batch, h1, 0.0)
            s1_ref[0:1, :] += jnp.sum(hm, axis=0, keepdims=True)
            s1_ref[1:2, :] += jnp.sum(hm * hm, axis=0, keepdims=True)

    @pl.when(phase == 2)
    def _phase2():
        mean1 = s1_ref[0:1, :] * inv_n
        var1 = s1_ref[1:2, :] * inv_n - mean1 * mean1
        scale1 = jax.lax.rsqrt(var1 + EPS) * g1_ref[...]
        shift1 = be1_ref[...] - mean1 * scale1
        h1 = h1_ref[pl.ds(row_start, tile_b), :].astype(jnp.float32)
        a1 = jnp.maximum(h1 * scale1 + shift1, 0.0)
        out = jnp.dot(a1.astype(jnp.bfloat16), w2_ref[...],
                      preferred_element_type=jnp.float32)           # (TB, W2_PAD)
        # Only the first OUT_PAD (>= 6) lanes carry payload; narrow HBM writeback.
        o_ref[...] = out[:, :OUT_PAD] + b2_ref[...]


def toxicity_forward(x, params, *, tile_b=512, hidden_dtype=None):
    """Fused ToxicityModel forward.

    `x` may be f32 or bf16 — passing bf16 straight through from the producer
    halves input HBM traffic (no wrapper-side cast pass is added here).
    """
    B, d_in = x.shape
    assert d_in == D_IN

    TB = min(tile_b, _round_up(B, 8))
    B_pad = _round_up(B, TB)
    n_tiles = B_pad // TB
    if B_pad != B:
        x = jnp.pad(x, ((0, B_pad - B), (0, 0)))     # zero pad rows

    # bf16 weights (halves weight DMA); final layer padded to a 128-wide MXU tile.
    w0 = params["w0"].astype(jnp.bfloat16)
    w1 = params["w1"].astype(jnp.bfloat16)
    w2 = jnp.zeros((D_H1, W2_PAD), jnp.bfloat16).at[:, :D_OUT].set(
        params["w2"].astype(jnp.bfloat16))
    b2 = jnp.zeros((1, OUT_PAD), jnp.float32).at[:, :D_OUT].set(params["b2"])

    # ---- VMEM budget (chip-aware, not hard-capped at a v7x-sized number) ----
    cap = _vmem_capacity_bytes()
    budget = cap - (6 << 20)                         # headroom for Mosaic internals
    bytes_w = (D_IN * D_H0 + D_H0 * D_H1 + D_H1 * W2_PAD) * 2
    bytes_small = (OUT_PAD + 2 * D_H0 + 2 * D_H1) * 4
    bytes_io = 2 * TB * D_IN * x.dtype.itemsize + 2 * TB * OUT_PAD * 4
    bytes_stats = (2 * D_H0 + 2 * D_H1) * 4
    fixed = 2 * (bytes_w + bytes_small) + bytes_io + bytes_stats

    if hidden_dtype is None:
        # f32 full-batch hidden scratch if it fits, else bf16 (halves the dominant
        # VMEM consumer; tiny extra quantization before the phase-1/2 matmuls).
        hidden_dtype = (jnp.float32
                        if fixed + B_pad * (D_H0 + D_H1) * 4 <= budget
                        else jnp.bfloat16)
    h_item = jnp.dtype(hidden_dtype).itemsize
    need = fixed + B_pad * (D_H0 + D_H1) * h_item
    vmem_limit = int(min(max(need + (4 << 20), 32 << 20), budget))

    def resident(shape):
        # Constant block index -> DMA'd once, stays VMEM-resident across the grid.
        return pl.BlockSpec(shape, lambda p, t: tuple(0 for _ in shape))

    last = n_tiles - 1
    x_spec = pl.BlockSpec(
        (TB, D_IN),
        # Stream batch tiles only in phase 0; freeze on the last fetched block
        # afterwards so the phase transition issues no extra x DMA.
        lambda p, t: (jnp.where(p == 0, t, last), 0))
    out_spec = pl.BlockSpec(
        (TB, OUT_PAD), lambda p, t: (jnp.where(p == 2, t, 0), 0))   # phase-2 only

    in_specs = [
        x_spec,
        resident((D_IN, D_H0)),       # w0
        resident((D_H0, D_H1)),       # w1
        resident((D_H1, W2_PAD)),     # w2 (padded)
        resident((1, OUT_PAD)),       # b2 (padded)
        resident((1, D_H0)),          # gamma0
        resident((1, D_H0)),          # beta0
        resident((1, D_H1)),          # gamma1
        resident((1, D_H1)),          # beta1
    ]

    scratch_shapes = [
        pltpu.VMEM((B_pad, D_H0), hidden_dtype),   # h0 (full batch)
        pltpu.VMEM((B_pad, D_H1), hidden_dtype),   # h1 (full batch)
        pltpu.VMEM((2, D_H0), jnp.float32),        # BN0 [sum, sum_sq]
        pltpu.VMEM((2, D_H1), jnp.float32),        # BN1 [sum, sum_sq]
    ]

    cost = pl.CostEstimate(
        flops=2 * B_pad * (D_IN * D_H0 + D_H0 * D_H1 + D_H1 * W2_PAD),
        transcendentals=D_H0 + D_H1,
        bytes_accessed=(B_pad * D_IN * x.dtype.itemsize + bytes_w + bytes_small
                        + B_pad * OUT_PAD * 4),
    )

    kernel = functools.partial(_toxicity_kernel, tile_b=TB, batch=B)

    out_narrow = pl.pallas_call(
        kernel,
        out_shape=jax.ShapeDtypeStruct((B_pad, OUT_PAD), jnp.float32),
        grid_spec=pltpu.PrefetchScalarGridSpec(
            num_scalar_prefetch=0,
            grid=(3, n_tiles),
            in_specs=in_specs,
            out_specs=out_spec,
            scratch_shapes=scratch_shapes,
        ),
        compiler_params=pltpu.CompilerParams(
            # Both axes carry cross-iteration state (phase ordering + full-batch
            # BN stats), so neither can be megacore-"parallel".
            dimension_semantics=("arbitrary", "arbitrary"),
            vmem_limit_bytes=vmem_limit,
        ),
        cost_estimate=cost,
    )(x, w0, w1, w2, b2,
      params["g0"], params["be0"], params["g1"], params["be1"])

    return out_narrow[:B, :D_OUT]


def init_params(key):
    ks = jax.random.split(key, 10)

    def linear(kw, kb, fan_in, fan_out):
        bound = 1.0 / jnp.sqrt(fan_in)
        w = jax.random.uniform(kw, (fan_in, fan_out), jnp.float32, -bound, bound)
        b = jax.random.uniform(kb, (1, fan_out), jnp.float32, -bound, bound)
        return w, b

    w0, b0 = linear(ks[0], ks[1], D_IN, D_H0)
    w1, b1 = linear(ks[2], ks[3], D_H0, D_H1)
    w2, b2 = linear(ks[4], ks[5], D_H1, D_OUT)
    # Non-trivial BN affine params so the self-check exercises gamma/beta.
    g0 = 1.0 + 0.1 * jax.random.normal(ks[6], (1, D_H0), jnp.float32)
    be0 = 0.1 * jax.random.normal(ks[7], (1, D_H0), jnp.float32)
    g1 = 1.0 + 0.1 * jax.random.normal(ks[8], (1, D_H1), jnp.float32)
    be1 = 0.1 * jax.random.normal(ks[9], (1, D_H1), jnp.float32)
    return {
        "w0": w0, "b0": b0, "g0": g0, "be0": be0,
        "w1": w1, "b1": b1, "g1": g1, "be1": be1,
        "w2": w2, "b2": b2,
    }


def reference_forward(x, p):
    """PyTorch-faithful forward (training-mode BN, biases included, two-pass var)
    with the same deliberate bf16 quantization of the matmul inputs."""
    def dot_bf16(a, w):
        return jnp.dot(a.astype(jnp.bfloat16), w.astype(jnp.bfloat16),
                       preferred_element_type=jnp.float32)

    def bn_relu(h, g, b):
        m = jnp.mean(h, axis=0, keepdims=True)
        v = jnp.mean((h - m) ** 2, axis=0, keepdims=True)
        return jnp.maximum((h - m) / jnp.sqrt(v + EPS) * g + b, 0.0)

    h = bn_relu(dot_bf16(x, p["w0"]) + p["b0"], p["g0"], p["be0"])
    h = bn_relu(dot_bf16(h, p["w1"]) + p["b1"], p["g1"], p["be1"])
    return dot_bf16(h, p["w2"]) + p["b2"]


if __name__ == "__main__":
    key = jax.random.PRNGKey(0)
    k_x, k_p = jax.random.split(key)
    B = 16  # small demo batch (multiple of 8 keeps sublane tiling clean)
    x = jax.random.normal(k_x, (B, D_IN), jnp.float32)
    params = init_params(k_p)

    out = toxicity_forward(x, params)
    out = jax.block_until_ready(out)

    ref = reference_forward(x, params)
    assert out.shape == (B, D_OUT)
    max_diff = float(jnp.max(jnp.abs(out - ref)))
    assert jnp.allclose(out, ref, atol=1e-3, rtol=1e-3), (
        f"mismatch vs JAX reference (max abs diff {max_diff:.3e})")

    print("KERNEL_OK")
</pallas_src>

<mosaic_0001>
module attributes {stable_mosaic.version = 11 : i64} {
  func.func @_toxicity_kernel(%arg0: i32, %arg1: i32, %arg2: memref<16x768xf32, #tpu.memory_space<vmem>>, %arg3: memref<768x512xbf16, #tpu.memory_space<vmem>>, %arg4: memref<512x128xbf16, #tpu.memory_space<vmem>>, %arg5: memref<128x128xbf16, #tpu.memory_space<vmem>>, %arg6: memref<1x8xf32, #tpu.memory_space<vmem>>, %arg7: memref<1x512xf32, #tpu.memory_space<vmem>>, %arg8: memref<1x512xf32, #tpu.memory_space<vmem>>, %arg9: memref<1x128xf32, #tpu.memory_space<vmem>>, %arg10: memref<1x128xf32, #tpu.memory_space<vmem>>, %arg11: memref<16x8xf32, #tpu.memory_space<vmem>>, %arg12: memref<16x512xf32, #tpu.memory_space<vmem>>, %arg13: memref<16x128xf32, #tpu.memory_space<vmem>>, %arg14: memref<2x512xf32, #tpu.memory_space<vmem>>, %arg15: memref<2x128xf32, #tpu.memory_space<vmem>>) attributes {dimension_semantics = [#tpu.dimension_semantics<arbitrary>, #tpu.dimension_semantics<arbitrary>], iteration_bounds = array<i64: 3, 1>, scalar_prefetch = 0 : i64, scratch_operands = 4 : i64, tpu.core_type = #tpu.core_type<tc>, window_params = [{transform_indices = @transform_0, window_bounds = array<i64: 16, 768>}, {pipeline_mode = #tpu.pipeline_mode<synchronous>, transform_indices = @transform_1, window_bounds = array<i64: 768, 512>}, {pipeline_mode = #tpu.pipeline_mode<synchronous>, transform_indices = @transform_2, window_bounds = array<i64: 512, 128>}, {pipeline_mode = #tpu.pipeline_mode<synchronous>, transform_indices = @transform_3, window_bounds = array<i64: 128, 128>}, {pipeline_mode = #tpu.pipeline_mode<synchronous>, transform_indices = @transform_4, window_bounds = array<i64: 1, 8>}, {pipeline_mode = #tpu.pipeline_mode<synchronous>, transform_indices = @transform_5, window_bounds = array<i64: 1, 512>}, {pipeline_mode = #tpu.pipeline_mode<synchronous>, transform_indices = @transform_6, window_bounds = array<i64: 1, 512>}, {pipeline_mode = #tpu.pipeline_mode<synchronous>, transform_indices = @transform_7, window_bounds = array<i64: 1, 128>}, {pipeline_mode = #tpu.pipeline_mode<synchronous>, transform_indices = @transform_8, window_bounds = array<i64: 1, 128>}, {transform_indices = @transform_9, window_bounds = array<i64: 16, 8>}]} {
    %c16_i32 = arith.constant 16 : i32
    %0 = arith.muli %arg1, %c16_i32 : i32
    %1 = tpu.assume_multiple %0, 16 : i32
    %c0_i32 = arith.constant 0 : i32
    %2 = arith.cmpi eq, %arg0, %c0_i32 : i32
    %c0_i32_0 = arith.constant 0 : i32
    %3 = arith.cmpi eq, %arg1, %c0_i32_0 : i32
    %4 = arith.andi %2, %3 : i1
    %5 = arith.extui %4 : i1 to i32
    %c0_i32_1 = arith.constant 0 : i32
    %6 = arith.cmpi ne, %5, %c0_i32_1 : i32
    scf.if %6 {
      %cst_7 = arith.constant 0.000000e+00 : f32
      %16 = vector.broadcast %cst_7 : f32 to vector<2x512xf32>
      %c0 = arith.constant 0 : index
      %c0_8 = arith.constant 0 : index
      %17 = vector.load %arg14[%c0, %c0_8] : memref<2x512xf32, #tpu.memory_space<vmem>>, vector<2x512xf32>
      tpu.vector_store %arg14[%c0, %c0_8], %16 {strides = array<i32>} : memref<2x512xf32, #tpu.memory_space<vmem>>, vector<2x512xf32>,
      %cst_9 = arith.constant 0.000000e+00 : f32
      %18 = vector.broadcast %cst_9 : f32 to vector<2x128xf32>
      %c0_10 = arith.constant 0 : index
      %c0_11 = arith.constant 0 : index
      %19 = vector.load %arg15[%c0_10, %c0_11] : memref<2x128xf32, #tpu.memory_space<vmem>>, vector<2x128xf32>
      tpu.vector_store %arg15[%c0_10, %c0_11], %18 {strides = array<i32>} : memref<2x128xf32, #tpu.memory_space<vmem>>, vector<2x128xf32>,
    } else {
    }
    %c0_i32_2 = arith.constant 0 : i32
    %7 = arith.cmpi eq, %arg0, %c0_i32_2 : i32
    %8 = arith.extui %7 : i1 to i32
    %c0_i32_3 = arith.constant 0 : i32
    %9 = arith.cmpi ne, %8, %c0_i32_3 : i32
    scf.if %9 {
      %c0 = arith.constant 0 : index
      %c0_7 = arith.constant 0 : index
      %16 = vector.load %arg2[%c0, %c0_7] : memref<16x768xf32, #tpu.memory_space<vmem>>, vector<16x768xf32>
      %17 = arith.truncf %16 : vector<16x768xf32> to vector<16x768xbf16>
      %c0_8 = arith.constant 0 : index
      %c0_9 = arith.constant 0 : index
      %18 = vector.load %arg3[%c0_8, %c0_9] : memref<768x512xbf16, #tpu.memory_space<vmem>>, vector<768x512xbf16>
      %cst_10 = arith.constant dense<0.000000e+00> : vector<16x512xf32>
      %19 = tpu.matmul %17, %18, %cst_10 {dimension_numbers = #tpu.dot_dimension_numbers<[1], [0], [0], [1], [0, 0, 1, 1], [], []>} : vector<16x768xbf16>, vector<768x512xbf16>, vector<16x512xf32> -> vector<16x512xf32>
      %20 = arith.index_cast %1 : i32 to index
      %c0_11 = arith.constant 0 : index
      %21 = vector.load %arg12[%20, %c0_11] : memref<16x512xf32, #tpu.memory_space<vmem>>, vector<16x512xf32>
      tpu.vector_store %arg12[%20, %c0_11], %19 {strides = array<i32>} : memref<16x512xf32, #tpu.memory_space<vmem>>, vector<16x512xf32>,
      %c0_12 = arith.constant 0 : index
      %c0_13 = arith.constant 0 : index
      %22 = vector.load %arg14[%c0_12, %c0_13] : memref<2x512xf32, #tpu.memory_space<vmem>>, vector<1x512xf32>
      %cst_14 = arith.constant dense<0.000000e+00> : vector<512xf32>
      %23 = vector.multi_reduction <add>, %19, %cst_14 [0] : vector<16x512xf32> to vector<512xf32>
      %24 = vector.shape_cast %23 : vector<512xf32> to vector<1x512xf32>
      %25 = arith.addf %22, %24 : vector<1x512xf32>
      %c0_15 = arith.constant 0 : index
      %c0_16 = arith.constant 0 : index
      %26 = vector.load %arg14[%c0_15, %c0_16] : memref<2x512xf32, #tpu.memory_space<vmem>>, vector<1x512xf32>
      tpu.vector_store %arg14[%c0_15, %c0_16], %25 {strides = array<i32>} : memref<2x512xf32, #tpu.memory_space<vmem>>, vector<1x512xf32>,
      %c1 = arith.constant 1 : index
      %c0_17 = arith.constant 0 : index
      %27 = vector.load %arg14[%c1, %c0_17] : memref<2x512xf32, #tpu.memory_space<vmem>>, vector<1x512xf32>
      %28 = arith.mulf %19, %19 : vector<16x512xf32>
      %cst_18 = arith.constant dense<0.000000e+00> : vector<512xf32>
      %29 = vector.multi_reduction <add>, %28, %cst_18 [0] : vector<16x512xf32> to vector<512xf32>
      %30 = vector.shape_cast %29 : vector<512xf32> to vector<1x512xf32>
      %31 = arith.addf %27, %30 : vector<1x512xf32>
      %c1_19 = arith.constant 1 : index
      %c0_20 = arith.constant 0 : index
      %32 = vector.load %arg14[%c1_19, %c0_20] : memref<2x512xf32, #tpu.memory_space<vmem>>, vector<1x512xf32>
      tpu.vector_store %arg14[%c1_19, %c0_20], %31 {strides = array<i32>} : memref<2x512xf32, #tpu.memory_space<vmem>>, vector<1x512xf32>,
    } else {
    }
    %c1_i32 = arith.constant 1 : i32
    %10 = arith.cmpi eq, %arg0, %c1_i32 : i32
    %11 = arith.extui %10 : i1 to i32
    %cst = arith.constant 6.250000e-02 : f32
    %c0_i32_4 = arith.constant 0 : i32
    %12 = arith.cmpi ne, %11, %c0_i32_4 : i32
    scf.if %12 {
      %c0 = arith.constant 0 : index
      %c0_7 = arith.constant 0 : index
      %16 = vector.load %arg14[%c0, %c0_7] : memref<2x512xf32, #tpu.memory_space<vmem>>, vector<1x512xf32>
      %17 = vector.broadcast %cst : f32 to vector<1x512xf32>
      %18 = arith.mulf %16, %17 : vector<1x512xf32>
      %c1 = arith.constant 1 : index
      %c0_8 = arith.constant 0 : index
      %19 = vector.load %arg14[%c1, %c0_8] : memref<2x512xf32, #tpu.memory_space<vmem>>, vector<1x512xf32>
      %20 = vector.broadcast %cst : f32 to vector<1x512xf32>
      %21 = arith.mulf %19, %20 : vector<1x512xf32>
      %22 = arith.mulf %18, %18 : vector<1x512xf32>
      %23 = arith.subf %21, %22 : vector<1x512xf32>
      %cst_9 = arith.constant 9.99999974E-6 : f32
      %24 = vector.broadcast %cst_9 : f32 to vector<1x512xf32>
      %25 = arith.addf %23, %24 : vector<1x512xf32>
      %26 = math.rsqrt %25 : vector<1x512xf32>
      %c0_10 = arith.constant 0 : index
      %c0_11 = arith.constant 0 : index
      %27 = vector.load %arg7[%c0_10, %c0_11] : memref<1x512xf32, #tpu.memory_space<vmem>>, vector<1x512xf32>
      %28 = arith.mulf %26, %27 : vector<1x512xf32>
      %c0_12 = arith.constant 0 : index
      %c0_13 = arith.constant 0 : index
      %29 = vector.load %arg8[%c0_12, %c0_13] : memref<1x512xf32, #tpu.memory_space<vmem>>, vector<1x512xf32>
      %30 = arith.mulf %18, %28 : vector<1x512xf32>
      %31 = arith.subf %29, %30 : vector<1x512xf32>
      %32 = arith.index_cast %1 : i32 to index
      %c0_14 = arith.constant 0 : index
      %33 = vector.load %arg12[%32, %c0_14] : memref<16x512xf32, #tpu.memory_space<vmem>>, vector<16x512xf32>
      %34 = vector.broadcast %28 : vector<1x512xf32> to vector<16x512xf32>
      %35 = arith.mulf %33, %34 : vector<16x512xf32>
      %36 = vector.broadcast %31 : vector<1x512xf32> to vector<16x512xf32>
      %37 = arith.addf %35, %36 : vector<16x512xf32>
      %cst_15 = arith.constant 0.000000e+00 : f32
      %38 = vector.broadcast %cst_15 : f32 to vector<16x512xf32>
      %39 = arith.maximumf %37, %38 : vector<16x512xf32>
      %40 = arith.truncf %39 : vector<16x512xf32> to vector<16x512xbf16>
      %c0_16 = arith.constant 0 : index
      %c0_17 = arith.constant 0 : index
      %41 = vector.load %arg4[%c0_16, %c0_17] : memref<512x128xbf16, #tpu.memory_space<vmem>>, vector<512x128xbf16>
      %cst_18 = arith.constant dense<0.000000e+00> : vector<16x128xf32>
      %42 = tpu.matmul %40, %41, %cst_18 {dimension_numbers = #tpu.dot_dimension_numbers<[1], [0], [0], [1], [0, 0, 1, 1], [], []>} : vector<16x512xbf16>, vector<512x128xbf16>, vector<16x128xf32> -> vector<16x128xf32>
      %43 = arith.index_cast %1 : i32 to index
      %c0_19 = arith.constant 0 : index
      %44 = vector.load %arg13[%43, %c0_19] : memref<16x128xf32, #tpu.memory_space<vmem>>, vector<16x128xf32>
      tpu.vector_store %arg13[%43, %c0_19], %42 {strides = array<i32>} : memref<16x128xf32, #tpu.memory_space<vmem>>, vector<16x128xf32>,
      %c0_i32_20 = arith.constant 0 : i32
      %45 = arith.cmpi ne, %arg1, %c0_i32_20 : i32
      %46 = arith.extui %45 : i1 to i32
      %c0_i32_21 = arith.constant 0 : i32
      %47 = arith.cmpi ne, %46, %c0_i32_21 : i32
      scf.if %47 {
        %c0_24 = arith.constant 0 : index
        %c0_25 = arith.constant 0 : index
        %51 = vector.load %arg15[%c0_24, %c0_25] : memref<2x128xf32, #tpu.memory_space<vmem>>, vector<1x128xf32>
        %cst_26 = arith.constant dense<0.000000e+00> : vector<128xf32>
        %52 = vector.multi_reduction <add>, %42, %cst_26 [0] : vector<16x128xf32> to vector<128xf32>
        %53 = vector.shape_cast %52 : vector<128xf32> to vector<1x128xf32>
        %54 = arith.addf %51, %53 : vector<1x128xf32>
        %c0_27 = arith.constant 0 : index
        %c0_28 = arith.constant 0 : index
        %55 = vector.load %arg15[%c0_27, %c0_28] : memref<2x128xf32, #tpu.memory_space<vmem>>, vector<1x128xf32>
        tpu.vector_store %arg15[%c0_27, %c0_28], %54 {strides = array<i32>} : memref<2x128xf32, #tpu.memory_space<vmem>>, vector<1x128xf32>,
        %c1_29 = arith.constant 1 : index
        %c0_30 = arith.constant 0 : index
        %56 = vector.load %arg15[%c1_29, %c0_30] : memref<2x128xf32, #tpu.memory_space<vmem>>, vector<1x128xf32>
        %57 = arith.mulf %42, %42 : vector<16x128xf32>
        %cst_31 = arith.constant dense<0.000000e+00> : vector<128xf32>
        %58 = vector.multi_reduction <add>, %57, %cst_31 [0] : vector<16x128xf32> to vector<128xf32>
        %59 = vector.shape_cast %58 : vector<128xf32> to vector<1x128xf32>
        %60 = arith.addf %56, %59 : vector<1x128xf32>
        %c1_32 = arith.constant 1 : index
        %c0_33 = arith.constant 0 : index
        %61 = vector.load %arg15[%c1_32, %c0_33] : memref<2x128xf32, #tpu.memory_space<vmem>>, vector<1x128xf32>
        tpu.vector_store %arg15[%c1_32, %c0_33], %60 {strides = array<i32>} : memref<2x128xf32, #tpu.memory_space<vmem>>, vector<1x128xf32>,
      } else {
      }
      %c0_i32_22 = arith.constant 0 : i32
      %48 = arith.cmpi eq, %arg1, %c0_i32_22 : i32
      %49 = arith.extui %48 : i1 to i32
      %c0_i32_23 = arith.constant 0 : i32
      %50 = arith.cmpi ne, %49, %c0_i32_23 : i32
      scf.if %50 {
        %c16_i32_24 = arith.constant 16 : i32
        %51 = arith.muli %arg1, %c16_i32_24 : i32
        %52 = tpu.iota {dimensions = array<i32: 0>} : vector<16x1xi32>
        %53 = vector.broadcast %51 : i32 to vector<16x1xi32>
        %54 = arith.addi %53, %52 : vector<16x1xi32>
        %c16_i32_25 = arith.constant 16 : i32
        %55 = vector.broadcast %c16_i32_25 : i32 to vector<16x1xi32>
        %56 = arith.cmpi slt, %54, %55 : vector<16x1xi32>
        %cst_26 = arith.constant 0.000000e+00 : f32
        %57 = vector.shape_cast %56 : vector<16x1xi1> to vector<16x1xi1>
        %58 = vector.broadcast %57 : vector<16x1xi1> to vector<16x128xi1>
        %59 = vector.broadcast %cst_26 : f32 to vector<16x128xf32>
        %60 = arith.select %58, %42, %59 : vector<16x128xi1>, vector<16x128xf32>
        %c0_27 = arith.constant 0 : index
        %c0_28 = arith.constant 0 : index
        %61 = vector.load %arg15[%c0_27, %c0_28] : memref<2x128xf32, #tpu.memory_space<vmem>>, vector<1x128xf32>
        %cst_29 = arith.constant dense<0.000000e+00> : vector<128xf32>
        %62 = vector.multi_reduction <add>, %60, %cst_29 [0] : vector<16x128xf32> to vector<128xf32>
        %63 = vector.shape_cast %62 : vector<128xf32> to vector<1x128xf32>
        %64 = arith.addf %61, %63 : vector<1x128xf32>
        %c0_30 = arith.constant 0 : index
        %c0_31 = arith.constant 0 : index
        %65 = vector.load %arg15[%c0_30, %c0_31] : memref<2x128xf32, #tpu.memory_space<vmem>>, vector<1x128xf32>
        tpu.vector_store %arg15[%c0_30, %c0_31], %64 {strides = array<i32>} : memref<2x128xf32, #tpu.memory_space<vmem>>, vector<1x128xf32>,
        %c1_32 = arith.constant 1 : index
        %c0_33 = arith.constant 0 : index
        %66 = vector.load %arg15[%c1_32, %c0_33] : memref<2x128xf32, #tpu.memory_space<vmem>>, vector<1x128xf32>
        %67 = arith.mulf %60, %60 : vector<16x128xf32>
        %cst_34 = arith.constant dense<0.000000e+00> : vector<128xf32>
        %68 = vector.multi_reduction <add>, %67, %cst_34 [0] : vector<16x128xf32> to vector<128xf32>
        %69 = vector.shape_cast %68 : vector<128xf32> to vector<1x128xf32>
        %70 = arith.addf %66, %69 : vector<1x128xf32>
        %c1_35 = arith.constant 1 : index
        %c0_36 = arith.constant 0 : index
        %71 = vector.load %arg15[%c1_35, %c0_36] : memref<2x128xf32, #tpu.memory_space<vmem>>, vector<1x128xf32>
        tpu.vector_store %arg15[%c1_35, %c0_36], %70 {strides = array<i32>} : memref<2x128xf32, #tpu.memory_space<vmem>>, vector<1x128xf32>,
      } else {
      }
    } else {
    }
    %c2_i32 = arith.constant 2 : i32
    %13 = arith.cmpi eq, %arg0, %c2_i32 : i32
    %14 = arith.extui %13 : i1 to i32
    %cst_5 = arith.constant 6.250000e-02 : f32
    %c0_i32_6 = arith.constant 0 : i32
    %15 = arith.cmpi ne, %14, %c0_i32_6 : i32
    scf.if %15 {
      %c0 = arith.constant 0 : index
      %c0_7 = arith.constant 0 : index
      %16 = vector.load %arg15[%c0, %c0_7] : memref<2x128xf32, #tpu.memory_space<vmem>>, vector<1x128xf32>
      %17 = vector.broadcast %cst_5 : f32 to vector<1x128xf32>
      %18 = arith.mulf %16, %17 : vector<1x128xf32>
      %c1 = arith.constant 1 : index
      %c0_8 = arith.constant 0 : index
      %19 = vector.load %arg15[%c1, %c0_8] : memref<2x128xf32, #tpu.memory_space<vmem>>, vector<1x128xf32>
      %20 = vector.broadcast %cst_5 : f32 to vector<1x128xf32>
      %21 = arith.mulf %19, %20 : vector<1x128xf32>
      %22 = arith.mulf %18, %18 : vector<1x128xf32>
      %23 = arith.subf %21, %22 : vector<1x128xf32>
      %cst_9 = arith.constant 9.99999974E-6 : f32
      %24 = vector.broadcast %cst_9 : f32 to vector<1x128xf32>
      %25 = arith.addf %23, %24 : vector<1x128xf32>
      %26 = math.rsqrt %25 : vector<1x128xf32>
      %c0_10 = arith.constant 0 : index
      %c0_11 = arith.constant 0 : index
      %27 = vector.load %arg9[%c0_10, %c0_11] : memref<1x128xf32, #tpu.memory_space<vmem>>, vector<1x128xf32>
      %28 = arith.mulf %26, %27 : vector<1x128xf32>
      %c0_12 = arith.constant 0 : index
      %c0_13 = arith.constant 0 : index
      %29 = vector.load %arg10[%c0_12, %c0_13] : memref<1x128xf32, #tpu.memory_space<vmem>>, vector<1x128xf32>
      %30 = arith.mulf %18, %28 : vector<1x128xf32>
      %31 = arith.subf %29, %30 : vector<1x128xf32>
      %32 = arith.index_cast %1 : i32 to index
      %c0_14 = arith.constant 0 : index
      %33 = vector.load %arg13[%32, %c0_14] : memref<16x128xf32, #tpu.memory_space<vmem>>, vector<16x128xf32>
      %34 = vector.broadcast %28 : vector<1x128xf32> to vector<16x128xf32>
      %35 = arith.mulf %33, %34 : vector<16x128xf32>
      %36 = vector.broadcast %31 : vector<1x128xf32> to vector<16x128xf32>
      %37 = arith.addf %35, %36 : vector<16x128xf32>
      %cst_15 = arith.constant 0.000000e+00 : f32
      %38 = vector.broadcast %cst_15 : f32 to vector<16x128xf32>
      %39 = arith.maximumf %37, %38 : vector<16x128xf32>
      %40 = arith.truncf %39 : vector<16x128xf32> to vector<16x128xbf16>
      %c0_16 = arith.constant 0 : index
      %c0_17 = arith.constant 0 : index
      %41 = vector.load %arg5[%c0_16, %c0_17] : memref<128x128xbf16, #tpu.memory_space<vmem>>, vector<128x128xbf16>
      %cst_18 = arith.constant dense<0.000000e+00> : vector<16x128xf32>
      %42 = tpu.matmul %40, %41, %cst_18 {dimension_numbers = #tpu.dot_dimension_numbers<[1], [0], [0], [1], [0, 0, 1, 1], [], []>} : vector<16x128xbf16>, vector<128x128xbf16>, vector<16x128xf32> -> vector<16x128xf32>
      %43 = vector.extract_strided_slice %42 {offsets = [0, 0], sizes = [16, 8], strides = [1, 1]} : vector<16x128xf32> to vector<16x8xf32>
      %c0_19 = arith.constant 0 : index
      %c0_20 = arith.constant 0 : index
      %44 = vector.load %arg6[%c0_19, %c0_20] : memref<1x8xf32, #tpu.memory_space<vmem>>, vector<1x8xf32>
      %45 = vector.broadcast %44 : vector<1x8xf32> to vector<16x8xf32>
      %46 = arith.addf %43, %45 : vector<16x8xf32>
      %c0_21 = arith.constant 0 : index
      %c0_22 = arith.constant 0 : index
      %47 = vector.load %arg11[%c0_21, %c0_22] : memref<16x8xf32, #tpu.memory_space<vmem>>, vector<16x8xf32>
      tpu.vector_store %arg11[%c0_21, %c0_22], %46 {strides = array<i32>} : memref<16x8xf32, #tpu.memory_space<vmem>>, vector<16x8xf32>,
    } else {
    }
    return
  }
  func.func @transform_0(%arg0: i32, %arg1: i32) -> (i32, i32) {
    %c0_i32 = arith.constant 0 : i32
    %0 = arith.cmpi eq, %arg0, %c0_i32 : i32
    %c0_i32_0 = arith.constant 0 : i32
    %1 = arith.select %0, %arg1, %c0_i32_0 : i32
    %c0_i32_1 = arith.constant 0 : i32
    %c0_i32_2 = arith.constant 0 : i32
    return %1, %c0_i32_1 : i32, i32
  }
  func.func @transform_1(%arg0: i32, %arg1: i32) -> (i32, i32) {
    %c0_i32 = arith.constant 0 : i32
    %c0_i32_0 = arith.constant 0 : i32
    %c0_i32_1 = arith.constant 0 : i32
    return %c0_i32, %c0_i32_0 : i32, i32
  }
  func.func @transform_2(%arg0: i32, %arg1: i32) -> (i32, i32) {
    %c0_i32 = arith.constant 0 : i32
    %c0_i32_0 = arith.constant 0 : i32
    %c0_i32_1 = arith.constant 0 : i32
    return %c0_i32, %c0_i32_0 : i32, i32
  }
  func.func @transform_3(%arg0: i32, %arg1: i32) -> (i32, i32) {
    %c0_i32 = arith.constant 0 : i32
    %c0_i32_0 = arith.constant 0 : i32
    %c0_i32_1 = arith.constant 0 : i32
    return %c0_i32, %c0_i32_0 : i32, i32
  }
  func.func @transform_4(%arg0: i32, %arg1: i32) -> (i32, i32) {
    %c0_i32 = arith.constant 0 : i32
    %c0_i32_0 = arith.constant 0 : i32
    %c0_i32_1 = arith.constant 0 : i32
    return %c0_i32, %c0_i32_0 : i32, i32
  }
  func.func @transform_5(%arg0: i32, %arg1: i32) -> (i32, i32) {
    %c0_i32 = arith.constant 0 : i32
    %c0_i32_0 = arith.constant 0 : i32
    %c0_i32_1 = arith.constant 0 : i32
    return %c0_i32, %c0_i32_0 : i32, i32
  }
  func.func @transform_6(%arg0: i32, %arg1: i32) -> (i32, i32) {
    %c0_i32 = arith.constant 0 : i32
    %c0_i32_0 = arith.constant 0 : i32
    %c0_i32_1 = arith.constant 0 : i32
    return %c0_i32, %c0_i32_0 : i32, i32
  }
  func.func @transform_7(%arg0: i32, %arg1: i32) -> (i32, i32) {
    %c0_i32 = arith.constant 0 : i32
    %c0_i32_0 = arith.constant 0 : i32
    %c0_i32_1 = arith.constant 0 : i32
    return %c0_i32, %c0_i32_0 : i32, i32
  }
  func.func @transform_8(%arg0: i32, %arg1: i32) -> (i32, i32) {
    %c0_i32 = arith.constant 0 : i32
    %c0_i32_0 = arith.constant 0 : i32
    %c0_i32_1 = arith.constant 0 : i32
    return %c0_i32, %c0_i32_0 : i32, i32
  }
  func.func @transform_9(%arg0: i32, %arg1: i32) -> (i32, i32) {
    %c2_i32 = arith.constant 2 : i32
    %0 = arith.cmpi eq, %arg0, %c2_i32 : i32
    %c0_i32 = arith.constant 0 : i32
    %1 = arith.select %0, %arg1, %c0_i32 : i32
    %c0_i32_0 = arith.constant 0 : i32
    %c0_i32_1 = arith.constant 0 : i32
    return %1, %c0_i32_0 : i32, i32
  }
}

</mosaic_0001>

<bundles_post_ra>
// kernel: tpu_custom_call.1
= control target key start
LH: loop header
LB: loop body
LE: loop exit
PB: predicated region body
PF: predicated region fallthrough
CT: control target
= control target key end

     0   :  { %s3943_s0 = inlined_call_operand.hbm [shape: f32[16,768], index: 0, kind: input, shape index: {}]   ;;  %s3944_s1 = inlined_call_operand.hbm [shape: bf16[768,512], index: 1, kind: input, shape index: {}]   ;;  %s3945_s2 = inlined_call_operand.hbm [shape: bf16[512,128], index: 2, kind: input, shape index: {}]   ;;  %s3946_s3 = inlined_call_operand.hbm [shape: bf16[128,128], index: 3, kind: input, shape index: {}]   ;;  %s3947_s4 = inlined_call_operand.vmem [shape: f32[1,8], index: 4, kind: input, shape index: {}]   ;;  %s3948_s5 = inlined_call_operand.vmem [shape: f32[1,512], index: 5, kind: input, shape index: {}]   ;;  %s3949_s6 = inlined_call_operand.vmem [shape: f32[1,512], index: 6, kind: input, shape index: {}]   ;;  %s3950_s7 = inlined_call_operand.vmem [shape: f32[1,128], index: 7, kind: input, shape index: {}]   ;;  %s3951_s8 = inlined_call_operand.vmem [shape: f32[1,128], index: 8, kind: input, shape index: {}]   ;;  %s3952_s9 = inlined_call_operand.vmem [shape: f32[16,8], index: 9, kind: output, shape index: {}]  }
   0x1   :  { %3956 = sst [smem:[#allocation16_spill]] %s3944_s1 }
   0x2   :  { %14 = vsyncpa [#allocation7], 0 }
   0x3   :  { %16 = vsyncpa [#allocation7 + $0x1], 0 }
   0x4   :  { %17 = vsyncpa [#allocation9], 0 }
   0x5   :  { %18 = vsyncpa [#allocation12], 0  ;;  %s3762_s30 = smov 0   ;;  %s3764_s10 = smov 0  }
   0x6   :  { %s3766_s11 = smov 0  }
   0x7 LB: > { %s2797_s12 = sadd.s32 4294967295, %s3696_s11   ;;  %s36_s13 = sadd.s32 1, %s3692_s10  ;;  %s3696_s11 = sphi %s3766_s11, %s24_s11   ;;  %s3692_s10 = sphi %s3764_s10, %s3968_s10   ;;  %s3688_s30 = sphi %s3762_s30, %s3967_s30  }
   0x8   : > { %p38_p0 = scmp.ge.s32.totalorder %s36_s13, 3  ;;  %p2799_p1 = scmp.ge.s32.totalorder %s3696_s11, 1 }
   0x9   : > { %p269_p2 = scmp.lt.s32.totalorder %s3696_s11, 4  ;;  %p3787_p4 = scmp.eq.s32.totalorder %s2797_s12, 0 }
   0xa   : > { %s3970_s13 = smov (%p38_p0, %s36_s13), 0  ;;  %s3698_s16 = smov [#allocation8]  }
   0xb   : > { %p3783_p3 = pnand %p2799_p1, %p269_p2  ;;  %s281_s17 = sshll.u32 %s3698_s16, 4  ;;  %s282_s17 = int_to_ptr.vmem [resolvable:$true] %s281_s17 }
   0xc   : > { %s3958_s15 = scalar_select %p3787_p4, 1, 0 }
   0xd   : > { %s3957_s14 = scalar_select %p3783_p3, 1, 0 }
   0xe   : > { %p3157_p5 = pneg %p3783_p3  ;;  %s3699_s19 = smov [#allocation10]  }
   0xf   : > { %s294_s20 = sshll.u32 %s3699_s19, 4  ;;  %s3960_s1 = sld [smem:[#allocation16_spill]]  ;;  %s295_s20 = int_to_ptr.vmem [resolvable:$true] %s294_s20 }
  0x10   : > { %p3795_p6 = pnand %p3787_p4, %p3157_p5 }
  0x12   : > { %p3807_p8 = pneg %p3795_p6 }
  0x15   : > { %s3550_s23 = scalar_lea.hbm %s3960_s1, 24576 }
  0x16   : > { %p3551_p7 = scmp.ne.s32.totalorder %s3960_s1, %s3550_s23  ;;  %p3557_p11 = scmp.lt.u32.totalorder %s3550_s23, %s3960_s1 }
  0x18   : > { %p3553_p9 = pnand %p3807_p8, %p3551_p7 }
  0x1a   : > { %p3554_p10 = pneg %p3553_p9 }
  0x1c   : > { %p3559_p12 = pnand %p3557_p11, %p3554_p10 }
  0x1e   : > { %3562 = shalt.err (!%p3559_p12)
}
  0x1f   : > { %s3563_s29 = scalar_lea.vmem %s282_s17, 24576  ;;  %p3571_p2 = scmp.lt.s32.totalorder %s282_s17, %s282_s17 }
  0x20   : > { %p3564_p13 = scmp.ne.s32.totalorder %s282_s17, %s3563_s29  ;;  %p3572_p5 = scmp.lt.s32.totalorder %s3563_s29, %s3563_s29 }
  0x22   : > { %p3566_p0 = pnand %p3564_p13, %p3807_p8  ;;  %p3573_p4 = por %p3572_p5, %p3571_p2 }
  0x24   : > { %p3567_p1 = pneg %p3566_p0 }
  0x26   : > { %p3574_p3 = pnand %p3573_p4, %p3567_p1 }
  0x28   : > { %3577 = shalt.err (!%p3574_p3)
}
  0x29   : > { %s3700_s12 = smov 256   ;;  %s3701_s16 = smov 16  }
  0x2a   : > { %3160 = dma.hbm_to_vmem [thread:$0]  (!%p3795_p6), %s3960_s1, 24576, %s282_s17, [#allocation9], %s3700_s12, %s3700_s12, %s3701_s16  }
  0x2b   : > { %s3578_s24 = scalar_lea.hbm %s3945_s2, 4096 }
  0x2c   : > { %p3579_p7 = scmp.ne.s32.totalorder %s3945_s2, %s3578_s24  ;;  %p3585_p9 = scmp.lt.u32.totalorder %s3578_s24, %s3945_s2 }
  0x2e   : > { %p3581_p3 = pnand %p3579_p7, %p3807_p8 }
  0x30   : > { %p3582_p4 = pneg %p3581_p3 }
  0x32   : > { %p3587_p10 = pnand %p3585_p9, %p3582_p4 }
  0x34   : > { %3590 = shalt.err (!%p3587_p10)
}
  0x35   : > { %s3591_s19 = scalar_lea.vmem %s295_s20, 4096  ;;  %p3599_p0 = scmp.lt.s32.totalorder %s295_s20, %s295_s20 }
  0x36   : > { %p3592_p11 = scmp.ne.s32.totalorder %s295_s20, %s3591_s19  ;;  %p3600_p1 = scmp.lt.s32.totalorder %s3591_s19, %s3591_s19 }
  0x38   : > { %p3594_p12 = pnand %p3592_p11, %p3807_p8  ;;  %p3601_p2 = por %p3600_p1, %p3599_p0 }
  0x3a   : > { %p3595_p13 = pneg %p3594_p12 }
  0x3c   : > { %p3602_p5 = pnand %p3601_p2, %p3595_p13 }
  0x3e   : > { %3605 = shalt.err (!%p3602_p5)
}
  0x3f   : > { %s3702_s17 = smov 64   ;;  %s3703_s12 = smov 4  }
  0x40   : > { %3163 = dma.hbm_to_vmem [thread:$0]  (!%p3795_p6), %s3945_s2, 4096, %s295_s20, [#allocation9], %s3702_s17, %s3702_s17, %s3703_s12  }
  0x41   : > { %s3704_s22 = smov [#allocation11]   ;;  %s3606_s27 = scalar_lea.hbm %s3946_s3, 1024 }
  0x42   : > { %s307_s23 = sshll.u32 %s3704_s22, 4  ;;  %p3607_p4 = scmp.ne.s32.totalorder %s3946_s3, %s3606_s27  ;;  %s308_s23 = int_to_ptr.vmem [resolvable:$true] %s307_s23 }
  0x43   : > { %p3613_p11 = scmp.lt.u32.totalorder %s3606_s27, %s3946_s3 }
  0x44   : > { %p3609_p9 = pnand %p3607_p4, %p3807_p8 }
  0x46   : > { %p3610_p10 = pneg %p3609_p9 }
  0x48   : > { %p3615_p12 = pnand %p3613_p11, %p3610_p10 }
  0x4a   : > { %3618 = shalt.err (!%p3615_p12)
}
  0x4b   : > { %s3619_s20 = scalar_lea.vmem %s308_s23, 1024  ;;  %p3627_p2 = scmp.lt.s32.totalorder %s308_s23, %s308_s23 }
  0x4c   : > { %p3620_p13 = scmp.ne.s32.totalorder %s308_s23, %s3619_s20  ;;  %p3628_p5 = scmp.lt.s32.totalorder %s3619_s20, %s3619_s20 }
  0x4e   : > { %p3622_p0 = pnand %p3620_p13, %p3807_p8  ;;  %p3629_p3 = por %p3628_p5, %p3627_p2 }
  0x50   : > { %p3623_p1 = pneg %p3622_p0 }
  0x52   : > { %p3630_p7 = pnand %p3629_p3, %p3623_p1 }
  0x54   : > { %3633 = shalt.err (!%p3630_p7)
}
  0x55   : > { %3166 = dma.hbm_to_vmem [thread:$0]  (!%p3795_p6), %s3946_s3, 1024, %s308_s23, [#allocation12], %s3702_s17, %s3702_s17, %s3703_s12  }
  0x56   : > { %p3962_p4 = scmp.lt.s32.totalorder %s3696_s11, 3  ;;  %p3963_p9 = scmp.eq.s32.totalorder %s3696_s11, 0 }
  0x57   : > { %s3705_s26 = smov [#allocation6]   ;;  %s3634_s18 = scalar_lea.hbm %s3943_s0, 1536 }
  0x58   : > { %p3865_p10 = pnand %p3963_p9, %p3962_p4  ;;  %s350_s22 = sshll.u32 %s3705_s26, 4  ;;  %s351_s22 = int_to_ptr.vmem [resolvable:$true] %s350_s22 }
  0x59   : > { %p3635_p8 = scmp.ne.s32.totalorder %s3943_s0, %s3634_s18  ;;  %p3641_p11 = scmp.lt.u32.totalorder %s3634_s18, %s3943_s0 }
  0x5a   : > { %p3636_p6 = pneg %p3865_p10 }
  0x5c   : > { %p3637_p7 = pnand %p3636_p6, %p3635_p8 }
  0x5e   : > { %p3638_p3 = pneg %p3637_p7 }
  0x60   : > { %p3643_p12 = pnand %p3641_p11, %p3638_p3 }
  0x62   : > { %3646 = shalt.err (!%p3643_p12)
}
  0x63   : > { %s3647_s23 = scalar_lea.vmem %s351_s22, 1536  ;;  %s3654_s29 = scalar_lea.vmem %s351_s22, 3072 }
  0x64   : > { %p3648_p13 = scmp.ne.s32.totalorder %s351_s22, %s3647_s23  ;;  %p3655_p2 = scmp.lt.s32.totalorder %s351_s22, %s351_s22 }
  0x65   : > { %p3656_p5 = scmp.lt.s32.totalorder %s3654_s29, %s3647_s23 }
  0x66   : > { %p3650_p0 = pnand %p3648_p13, %p3636_p6 }
  0x67   : > { %p3657_p4 = por %p3656_p5, %p3655_p2 }
  0x68   : > { %p3651_p1 = pneg %p3650_p0 }
  0x6a   : > { %p3658_p9 = pnand %p3657_p4, %p3651_p1 }
  0x6c   : > { %3661 = shalt.err (!%p3658_p9)
}
  0x6d   : > { %s3706_s19 = smov 768   ;;  %s3707_s20 = smov 48  }
  0x6e   : > { %3170 = dma.hbm_to_vmem [thread:$0]  (!%p3865_p10), %s3943_s0, 1536, %s351_s22, [#allocation7], %s3706_s19, %s3706_s19, %s3707_s20  }
  0x6f   : > { %p3965_p8 = scmp.ne.s32.totalorder %s3957_s14, 0 }
  0x70   : > { %p3966_p6 = scmp.ne.s32.totalorder (!%p3965_p8), %s3958_s15, 0 }
  0x71   : > { %362 = sbr.rel (%p3965_p8) target bundleno = 1112 (0x458), region = 56 }
  0x78   : > { %3675 = dma.done.wait (%p3966_p6), [#allocation7], 1536  }
  0x79   : > { %3677 = vsyncadd (%p3966_p6), [#allocation7], 4294965760 }
  0x7a   : > { %3679 = dma.done.wait (%p3966_p6), [#allocation9], 28672  }
  0x7b   : > { %3681 = vsyncadd (%p3966_p6), [#allocation9], 4294938624 }
  0x7c   : > { %3683 = dma.done.wait (%p3966_p6), [#allocation12], 1024  }
  0x7d   : > { %3685 = vsyncadd (%p3966_p6), [#allocation12], 4294966272  ;;  %p432_p10 = scmp.eq.s32.totalorder %s3688_s30, 0 }
  0x7e   : > { %v3708_v0 = vmov (%p432_p10), 0.0  }
  0x7f   : > { %437 = sbr.rel (!%p432_p10) target bundleno = 134 (0x86), region = 76  ;;  %438 = vst [vmem:[#allocation4] sm:$0xff] (%p432_p10), %v3708_v0  ;;  %439 = vst [vmem:[#allocation5] sm:$0x3] (%p432_p10), %v3708_v0 }
  0x86 PF: > { %p2811_p7 = scmp.ne.s32.totalorder %s3688_s30, 0 }
  0x87   : > { %v3218_v1 = vld [vmem:[#allocation8 + $0x4] ss:$16 sps:$4 sm:$0xff] (!%p2811_p7)   ;;  %v3220_v2 = vld [vmem:[#allocation8 + $0xc] ss:$16 sps:$4 sm:$0xff] (!%p2811_p7)   ;;  %v3222_v3 = vld [vmem:[#allocation8] ss:$16 sps:$4 sm:$0xff] (!%p2811_p7)  }
  0x88   : > { %442 = sbr.rel (%p2811_p7) target bundleno = 571 (0x23b), region = 80  ;;  %1613 = vmatprep.subr.bf16.mxu0 (!%p2811_p7), %v3218_v1  ;;  %v3223_v4 = vld [vmem:[#allocation8 + $0x8] ss:$16 sps:$4 sm:$0xff] (!%p2811_p7)   ;;  %1742 = vmatprep.subr.bf16.mxu1 (!%p2811_p7), %v3220_v2  ;;  %v3224_v5 = vld [vmem:[#allocation8 + $0x24] ss:$16 sps:$4 sm:$0xff] (!%p2811_p7)  }
  0x89   : > { %1614 = vmatpush1.bf16.msra.mxu0 (!%p2811_p7), %v3222_v3  ;;  %1743 = vmatpush1.bf16.msra.mxu1 (!%p2811_p7), %v3223_v4  ;;  %v3226_v6 = vld [vmem:[#allocation8 + $0x2c] ss:$16 sps:$4 sm:$0xff] (!%p2811_p7)   ;;  %v3228_v7 = vld [vmem:[#allocation8 + $0x20] ss:$16 sps:$4 sm:$0xff] (!%p2811_p7)   ;;  %v3229_v8 = vld [vmem:[#allocation8 + $0x28] ss:$16 sps:$4 sm:$0xff] (!%p2811_p7)  }
  0x8a   : > { %1615 = vmatprep.subr.bf16.mxu0 (!%p2811_p7), %v3224_v5  ;;  %1744 = vmatprep.subr.bf16.mxu1 (!%p2811_p7), %v3226_v6  ;;  %v3230_v9 = vld [vmem:[#allocation8 + $0x44] ss:$16 sps:$4 sm:$0xff] (!%p2811_p7)   ;;  %v3232_v10 = vld [vmem:[#allocation8 + $0x4c] ss:$16 sps:$4 sm:$0xff] (!%p2811_p7)   ;;  %v3234_v11 = vld [vmem:[#allocation8 + $0x40] ss:$16 sps:$4 sm:$0xff] (!%p2811_p7)  }
  0x8b   : > { %v3235_v12 = vld [vmem:[#allocation8 + $0x48] ss:$16 sps:$4 sm:$0xff] (!%p2811_p7)   ;;  %v3236_v13 = vld [vmem:[#allocation8 + $0x64] ss:$16 sps:$4 sm:$0xff] (!%p2811_p7)   ;;  %v3238_v14 = vld [vmem:[#allocation8 + $0x6c] ss:$16 sps:$4 sm:$0xff] (!%p2811_p7)  }
  0x8c   : > { %v3240_v15 = vld [vmem:[#allocation8 + $0x60] ss:$16 sps:$4 sm:$0xff] (!%p2811_p7)   ;;  %v3241_v16 = vld [vmem:[#allocation8 + $0x68] ss:$16 sps:$4 sm:$0xff] (!%p2811_p7)   ;;  %v3242_v17 = vld [vmem:[#allocation8 + $0x84] ss:$16 sps:$4 sm:$0xff] (!%p2811_p7)  }
  0x8d   : > { %1616 = vmatpush1.bf16.msra.mxu0 (!%p2811_p7), %v3228_v7  ;;  %1745 = vmatpush1.bf16.msra.mxu1 (!%p2811_p7), %v3229_v8  ;;  %v3244_v18 = vld [vmem:[#allocation8 + $0x8c] ss:$16 sps:$4 sm:$0xff] (!%p2811_p7)   ;;  %v3246_v19 = vld [vmem:[#allocation8 + $0x80] ss:$16 sps:$4 sm:$0xff] (!%p2811_p7)   ;;  %v3247_v20 = vld [vmem:[#allocation8 + $0x88] ss:$16 sps:$4 sm:$0xff] (!%p2811_p7)  }
  0x8e   : > { %1617 = vmatprep.subr.bf16.mxu0 (!%p2811_p7), %v3230_v9  ;;  %1746 = vmatprep.subr.bf16.mxu1 (!%p2811_p7), %v3232_v10  ;;  %v3248_v21 = vld [vmem:[#allocation8 + $0xa4] ss:$16 sps:$4 sm:$0xff] (!%p2811_p7)   ;;  %v3250_v22 = vld [vmem:[#allocation8 + $0xac] ss:$16 sps:$4 sm:$0xff] (!%p2811_p7)   ;;  %v3252_v23 = vld [vmem:[#allocation8 + $0xa0] ss:$16 sps:$4 sm:$0xff] (!%p2811_p7)  }
  0x8f   : > { %v3253_v24 = vld [vmem:[#allocation8 + $0xa8] ss:$16 sps:$4 sm:$0xff]   ;;  %v3254_v25 = vld [vmem:[#allocation8 + $0xc4] ss:$16 sps:$4 sm:$0xff]   ;;  %v3256_v26 = vld [vmem:[#allocation8 + $0xcc] ss:$16 sps:$4 sm:$0xff]  }
  0x90   : > { %v3258_v27 = vld [vmem:[#allocation8 + $0xc0] ss:$16 sps:$4 sm:$0xff]   ;;  %v3259_v28 = vld [vmem:[#allocation8 + $0xc8] ss:$16 sps:$4 sm:$0xff]   ;;  %v3260_v29 = vld [vmem:[#allocation8 + $0xe4] ss:$16 sps:$4 sm:$0xff]  }
  0x91   : > { %1618 = vmatpush1.bf16.msra.mxu0 %v3234_v11  ;;  %1747 = vmatpush1.bf16.msra.mxu1 %v3235_v12  ;;  %v3262_v30 = vld [vmem:[#allocation8 + $0xec] ss:$16 sps:$4 sm:$0xff]   ;;  %v3264_v31 = vld [vmem:[#allocation8 + $0xe0] ss:$16 sps:$4 sm:$0xff]   ;;  %v3265_v32 = vld [vmem:[#allocation8 + $0xe8] ss:$16 sps:$4 sm:$0xff]  }
  0x92   : > { %1619 = vmatprep.subr.bf16.mxu0 %v3236_v13  ;;  %1748 = vmatprep.subr.bf16.mxu1 %v3238_v14  ;;  %v3266_v33 = vld [vmem:[#allocation8 + $0x104] ss:$16 sps:$4 sm:$0xff]   ;;  %v3268_v34 = vld [vmem:[#allocation8 + $0x10c] ss:$16 sps:$4 sm:$0xff]   ;;  %v3270_v35 = vld [vmem:[#allocation8 + $0x100] ss:$16 sps:$4 sm:$0xff]  }
  0x93   : > { %v3271_v36 = vld [vmem:[#allocation8 + $0x108] ss:$16 sps:$4 sm:$0xff]   ;;  %v3272_v37 = vld [vmem:[#allocation8 + $0x124] ss:$16 sps:$4 sm:$0xff]   ;;  %v3274_v38 = vld [vmem:[#allocation8 + $0x12c] ss:$16 sps:$4 sm:$0xff]  }
  0x94   : > { %v3276_v39 = vld [vmem:[#allocation8 + $0x120] ss:$16 sps:$4 sm:$0xff]   ;;  %v3277_v40 = vld [vmem:[#allocation8 + $0x128] ss:$16 sps:$4 sm:$0xff]   ;;  %v3278_v41 = vld [vmem:[#allocation8 + $0x144] ss:$16 sps:$4 sm:$0xff]  }
  0x95   : > { %1620 = vmatpush1.bf16.msra.mxu0 %v3240_v15  ;;  %1749 = vmatpush1.bf16.msra.mxu1 %v3241_v16  ;;  %v3280_v42 = vld [vmem:[#allocation8 + $0x14c] ss:$16 sps:$4 sm:$0xff]   ;;  %v3282_v43 = vld [vmem:[#allocation8 + $0x140] ss:$16 sps:$4 sm:$0xff]   ;;  %v3283_v44 = vld [vmem:[#allocation8 + $0x148] ss:$16 sps:$4 sm:$0xff]  }
  0x96   : > { %1621 = vmatprep.subr.bf16.mxu0 %v3242_v17  ;;  %1750 = vmatprep.subr.bf16.mxu1 %v3244_v18  ;;  %v3284_v45 = vld [vmem:[#allocation8 + $0x164] ss:$16 sps:$4 sm:$0xff]   ;;  %v3286_v46 = vld [vmem:[#allocation8 + $0x16c] ss:$16 sps:$4 sm:$0xff]   ;;  %v3288_v49 = vld [vmem:[#allocation8 + $0x160] ss:$16 sps:$4 sm:$0xff]  }
  0x97   : > { %v444_v47 = vld [vmem:[#allocation6 + $0x8] sm:$0xff]  ;;  %v450_v48 = vld [vmem:[#allocation6 + $0x38] sm:$0xff]  ;;  %v3290_v52 = vld [vmem:[#allocation8 + $0x184] ss:$16 sps:$4 sm:$0xff]  }
  0x98   : > { %v3289_v50 = vld [vmem:[#allocation8 + $0x168] ss:$16 sps:$4 sm:$0xff]   ;;  %v456_v51 = vpack.c.bf16 %v450_v48, %v444_v47  ;;  %v3292_v53 = vld [vmem:[#allocation8 + $0x18c] ss:$16 sps:$4 sm:$0xff]   ;;  %v3294_v54 = vld [vmem:[#allocation8 + $0x180] ss:$16 sps:$4 sm:$0xff]  }
  0x99   : > { %1622 = vmatpush1.bf16.msra.mxu0 %v3246_v19  ;;  %1751 = vmatpush1.bf16.msra.mxu1 %v3247_v20  ;;  %v3295_v55 = vld [vmem:[#allocation8 + $0x188] ss:$16 sps:$4 sm:$0xff]   ;;  %v3296_v56 = vld [vmem:[#allocation8 + $0x1a4] ss:$16 sps:$4 sm:$0xff]   ;;  %v3298_v57 = vld [vmem:[#allocation8 + $0x1ac] ss:$16 sps:$4 sm:$0xff]  }
  0x9a   : > { %1623 = vmatprep.subr.bf16.mxu0 %v3248_v21  ;;  %1752 = vmatprep.subr.bf16.mxu1 %v3250_v22  ;;  %v3300_v58 = vld [vmem:[#allocation8 + $0x1a0] ss:$16 sps:$4 sm:$0xff]   ;;  %v3301_v59 = vld [vmem:[#allocation8 + $0x1a8] ss:$16 sps:$4 sm:$0xff]   ;;  %v3302_v60 = vld [vmem:[#allocation8 + $0x1c4] ss:$16 sps:$4 sm:$0xff]  }
  0x9b   : > { %1645 = vmatprep.mubr.bf16.mxu0 %v456_v51  ;;  %1774 = vmatprep.mubr.bf16.mxu1 %v456_v51  ;;  %v3304_v61 = vld [vmem:[#allocation8 + $0x1cc] ss:$16 sps:$4 sm:$0xff]   ;;  %v3306_v62 = vld [vmem:[#allocation8 + $0x1c0] ss:$16 sps:$4 sm:$0xff]   ;;  %v3307_v63 = vld [vmem:[#allocation8 + $0x1c8] ss:$16 sps:$4 sm:$0xff]  }
  0x9c   : > { %v3308_v0 = vld [vmem:[#allocation8 + $0x1e4] ss:$16 sps:$4 sm:$0xff]   ;;  %v3310_v1 = vld [vmem:[#allocation8 + $0x1ec] ss:$16 sps:$4 sm:$0xff]   ;;  %v3312_v2 = vld [vmem:[#allocation8 + $0x1e0] ss:$16 sps:$4 sm:$0xff]  }
  0x9d   : > { %1624 = vmatpush1.bf16.msra.mxu0 %v3252_v23  ;;  %1753 = vmatpush1.bf16.msra.mxu1 %v3253_v24  ;;  %v3313_v3 = vld [vmem:[#allocation8 + $0x1e8] ss:$16 sps:$4 sm:$0xff]   ;;  %v3316_v4 = vld [vmem:[#allocation8 + $0x204] ss:$16 sps:$4 sm:$0xff]   ;;  %v3319_v7 = vld [vmem:[#allocation8 + $0x20c] ss:$16 sps:$4 sm:$0xff]  }
  0x9e   : > { %1625 = vmatprep.subr.bf16.mxu0 %v3254_v25  ;;  %1754 = vmatprep.subr.bf16.mxu1 %v3256_v26  ;;  %v443_v5 = vld [vmem:[#allocation6] sm:$0xff]  ;;  %v449_v6 = vld [vmem:[#allocation6 + $0x30] sm:$0xff]  ;;  %v3317_v9 = vld [vmem:[#allocation8 + $0x208] ss:$16 sps:$4 sm:$0xff]  }
  0x9f   : > { %v3314_v8 = vld [vmem:[#allocation8 + $0x200] ss:$16 sps:$4 sm:$0xff]   ;;  %v455_v10 = vpack.c.bf16 %v449_v6, %v443_v5  ;;  %v3322_v11 = vld [vmem:[#allocation8 + $0x224] ss:$16 sps:$4 sm:$0xff]   ;;  %v3325_v12 = vld [vmem:[#allocation8 + $0x22c] ss:$16 sps:$4 sm:$0xff]  }
  0xa0   : > { %v3320_v13 = vld [vmem:[#allocation8 + $0x220] ss:$16 sps:$4 sm:$0xff]   ;;  %v3323_v14 = vld [vmem:[#allocation8 + $0x228] ss:$16 sps:$4 sm:$0xff]   ;;  %v3328_v15 = vld [vmem:[#allocation8 + $0x244] ss:$16 sps:$4 sm:$0xff]  }
  0xa1   : > { %1626 = vmatpush1.bf16.msra.mxu0 %v3258_v27  ;;  %1755 = vmatpush1.bf16.msra.mxu1 %v3259_v28  ;;  %v3331_v16 = vld [vmem:[#allocation8 + $0x24c] ss:$16 sps:$4 sm:$0xff]   ;;  %v3326_v17 = vld [vmem:[#allocation8 + $0x240] ss:$16 sps:$4 sm:$0xff]   ;;  %v3329_v18 = vld [vmem:[#allocation8 + $0x248] ss:$16 sps:$4 sm:$0xff]  }
  0xa2   : > { %1627 = vmatprep.subr.bf16.mxu0 %v3260_v29  ;;  %1756 = vmatprep.subr.bf16.mxu1 %v3262_v30  ;;  %v3334_v19 = vld [vmem:[#allocation8 + $0x264] ss:$16 sps:$4 sm:$0xff]   ;;  %v3337_v20 = vld [vmem:[#allocation8 + $0x26c] ss:$16 sps:$4 sm:$0xff]   ;;  %v3332_v21 = vld [vmem:[#allocation8 + $0x260] ss:$16 sps:$4 sm:$0xff]  }
  0xa3   : > { %v3335_v22 = vld [vmem:[#allocation8 + $0x268] ss:$16 sps:$4 sm:$0xff]   ;;  %v3340_v23 = vld [vmem:[#allocation8 + $0x284] ss:$16 sps:$4 sm:$0xff]   ;;  %v3343_v24 = vld [vmem:[#allocation8 + $0x28c] ss:$16 sps:$4 sm:$0xff]  }
  0xa4   : > { %v3338_v25 = vld [vmem:[#allocation8 + $0x280] ss:$16 sps:$4 sm:$0xff]   ;;  %v3341_v26 = vld [vmem:[#allocation8 + $0x288] ss:$16 sps:$4 sm:$0xff]   ;;  %v3346_v27 = vld [vmem:[#allocation8 + $0x2a4] ss:$16 sps:$4 sm:$0xff]  }
  0xa5   : > { %1628 = vmatpush1.bf16.msra.mxu0 %v3264_v31  ;;  %1757 = vmatpush1.bf16.msra.mxu1 %v3265_v32  ;;  %v3349_v28 = vld [vmem:[#allocation8 + $0x2ac] ss:$16 sps:$4 sm:$0xff]   ;;  %v3344_v29 = vld [vmem:[#allocation8 + $0x2a0] ss:$16 sps:$4 sm:$0xff]   ;;  %v3347_v30 = vld [vmem:[#allocation8 + $0x2a8] ss:$16 sps:$4 sm:$0xff]  }
  0xa6   : > { %1629 = vmatprep.subr.bf16.mxu0 %v3266_v33  ;;  %1758 = vmatprep.subr.bf16.mxu1 %v3268_v34  ;;  %v3352_v31 = vld [vmem:[#allocation8 + $0x2c4] ss:$16 sps:$4 sm:$0xff]   ;;  %v3355_v32 = vld [vmem:[#allocation8 + $0x2cc] ss:$16 sps:$4 sm:$0xff]   ;;  %v3368_v48 = vld [vmem:[#allocation8 + $0x320] ss:$16 sps:$4 sm:$0xff]  }
  0xa7   : > { %v446_v33 = vld [vmem:[#allocation6 + $0x18] sm:$0xff]  ;;  %v452_v34 = vld [vmem:[#allocation6 + $0x48] sm:$0xff]  ;;  %v3406_v6 = vld [vmem:[#allocation8 + $0x3e4] ss:$16 sps:$4 sm:$0xff]  }
  0xa8   : > { %v3373_v47 = vld [vmem:[#allocation8 + $0x32c] ss:$16 sps:$4 sm:$0xff]   ;;  %v3401_v5 = vld [vmem:[#allocation8 + $0x3c8] ss:$16 sps:$4 sm:$0xff]  }
  0xa9   : > { %1630 = vmatpush1.bf16.msra.mxu0 %v3270_v35  ;;  %1759 = vmatpush1.bf16.msra.mxu1 %v3271_v36  ;;  %v3350_v35 = vld [vmem:[#allocation8 + $0x2c0] ss:$16 sps:$4 sm:$0xff]   ;;  %v3353_v36 = vld [vmem:[#allocation8 + $0x2c8] ss:$16 sps:$4 sm:$0xff]   ;;  %v3379_v51 = vld [vmem:[#allocation8 + $0x34c] ss:$16 sps:$4 sm:$0xff]  }
  0xaa   : > { %1631 = vmatprep.subr.bf16.mxu0 %v3272_v37  ;;  %1760 = vmatprep.subr.bf16.mxu1 %v3274_v38  ;;  %v458_v37 = vpack.c.bf16 %v452_v34, %v446_v33  ;;  %v3358_v38 = vld [vmem:[#allocation8 + $0x2e4] ss:$16 sps:$4 sm:$0xff]   ;;  %v3439_v33 = vld [vmem:[#allocation8 + $0x48c] ss:$16 sps:$4 sm:$0xff]   ;;  %v3434_v34 = vld [vmem:[#allocation8 + $0x480] ss:$16 sps:$4 sm:$0xff]  }
  0xad   : > { %1632 = vmatpush1.bf16.msra.mxu0 %v3276_v39  ;;  %1761 = vmatpush1.bf16.msra.mxu1 %v3277_v40  ;;  %v3361_v39 = vld [vmem:[#allocation8 + $0x2ec] ss:$16 sps:$4 sm:$0xff]   ;;  %v3356_v40 = vld [vmem:[#allocation8 + $0x2e0] ss:$16 sps:$4 sm:$0xff]  }
  0xae   : > { %1633 = vmatprep.subr.bf16.mxu0 %v3278_v41  ;;  %1762 = vmatprep.subr.bf16.mxu1 %v3280_v42  ;;  %v3359_v41 = vld [vmem:[#allocation8 + $0x2e8] ss:$16 sps:$4 sm:$0xff]   ;;  %v3364_v42 = vld [vmem:[#allocation8 + $0x304] ss:$16 sps:$4 sm:$0xff]  }
  0xb1   : > { %1634 = vmatpush1.bf16.msra.mxu0 %v3282_v43  ;;  %1763 = vmatpush1.bf16.msra.mxu1 %v3283_v44  ;;  %v3367_v43 = vld [vmem:[#allocation8 + $0x30c] ss:$16 sps:$4 sm:$0xff]   ;;  %v3362_v44 = vld [vmem:[#allocation8 + $0x300] ss:$16 sps:$4 sm:$0xff]  }
  0xb2   : > { %1635 = vmatprep.subr.bf16.mxu0 %v3284_v45  ;;  %1764 = vmatprep.subr.bf16.mxu1 %v3286_v46  ;;  %v3365_v45 = vld [vmem:[#allocation8 + $0x308] ss:$16 sps:$4 sm:$0xff]   ;;  %v3370_v46 = vld [vmem:[#allocation8 + $0x324] ss:$16 sps:$4 sm:$0xff]  }
  0xb5   : > { %1636 = vmatpush1.bf16.msra.mxu0 %v3288_v49  ;;  %1765 = vmatpush1.bf16.msra.mxu1 %v3289_v50  ;;  %v3371_v49 = vld [vmem:[#allocation8 + $0x328] ss:$16 sps:$4 sm:$0xff]   ;;  %v3376_v50 = vld [vmem:[#allocation8 + $0x344] ss:$16 sps:$4 sm:$0xff]  }
  0xb6   : > { %1637 = vmatprep.subr.bf16.mxu0 %v3290_v52  ;;  %1766 = vmatprep.subr.bf16.mxu1 %v3292_v53  ;;  %v3374_v52 = vld [vmem:[#allocation8 + $0x340] ss:$16 sps:$4 sm:$0xff]   ;;  %v3377_v53 = vld [vmem:[#allocation8 + $0x348] ss:$16 sps:$4 sm:$0xff]  }
  0xb9   : > { %1638 = vmatpush1.bf16.msra.mxu0 %v3294_v54  ;;  %1767 = vmatpush1.bf16.msra.mxu1 %v3295_v55  ;;  %v3382_v54 = vld [vmem:[#allocation8 + $0x364] ss:$16 sps:$4 sm:$0xff]   ;;  %v3385_v55 = vld [vmem:[#allocation8 + $0x36c] ss:$16 sps:$4 sm:$0xff]  }
  0xba   : > { %1639 = vmatprep.subr.bf16.mxu0 %v3296_v56  ;;  %1768 = vmatprep.subr.bf16.mxu1 %v3298_v57  ;;  %v3380_v56 = vld [vmem:[#allocation8 + $0x360] ss:$16 sps:$4 sm:$0xff]   ;;  %v3383_v57 = vld [vmem:[#allocation8 + $0x368] ss:$16 sps:$4 sm:$0xff]  }
  0xbd   : > { %1640 = vmatpush1.bf16.msra.mxu0 %v3300_v58  ;;  %1769 = vmatpush1.bf16.msra.mxu1 %v3301_v59  ;;  %v3388_v58 = vld [vmem:[#allocation8 + $0x384] ss:$16 sps:$4 sm:$0xff]   ;;  %v3391_v59 = vld [vmem:[#allocation8 + $0x38c] ss:$16 sps:$4 sm:$0xff]  }
  0xbe   : > { %1641 = vmatprep.subr.bf16.mxu0 %v3302_v60  ;;  %1770 = vmatprep.subr.bf16.mxu1 %v3304_v61  ;;  %v3386_v60 = vld [vmem:[#allocation8 + $0x380] ss:$16 sps:$4 sm:$0xff]   ;;  %v3389_v61 = vld [vmem:[#allocation8 + $0x388] ss:$16 sps:$4 sm:$0xff]  }
  0xc1   : > { %1642 = vmatpush1.bf16.msra.mxu0 %v3306_v62  ;;  %1771 = vmatpush1.bf16.msra.mxu1 %v3307_v63  ;;  %v3394_v62 = vld [vmem:[#allocation8 + $0x3a4] ss:$16 sps:$4 sm:$0xff]   ;;  %v3397_v63 = vld [vmem:[#allocation8 + $0x3ac] ss:$16 sps:$4 sm:$0xff]  }
  0xc2   : > { %1643 = vmatprep.subr.bf16.mxu0 %v3308_v0  ;;  %1772 = vmatprep.subr.bf16.mxu1 %v3310_v1  ;;  %v3392_v0 = vld [vmem:[#allocation8 + $0x3a0] ss:$16 sps:$4 sm:$0xff]   ;;  %v3395_v1 = vld [vmem:[#allocation8 + $0x3a8] ss:$16 sps:$4 sm:$0xff]  }
  0xc5   : > { %1644 = vmatpush1.bf16.msra.mxu0 %v3312_v2  ;;  %1773 = vmatpush1.bf16.msra.mxu1 %v3313_v3  ;;  %v3400_v2 = vld [vmem:[#allocation8 + $0x3c4] ss:$16 sps:$4 sm:$0xff]   ;;  %v3403_v3 = vld [vmem:[#allocation8 + $0x3cc] ss:$16 sps:$4 sm:$0xff]  }
  0xc6   : > { %1656 = vmatprep.subr.bf16.mxu0 %v3316_v4  ;;  %1785 = vmatprep.subr.bf16.mxu1 %v3319_v7  ;;  %v3398_v4 = vld [vmem:[#allocation8 + $0x3c0] ss:$16 sps:$4 sm:$0xff]   ;;  %v3409_v7 = vld [vmem:[#allocation8 + $0x3ec] ss:$16 sps:$4 sm:$0xff]  }
  0xc8   : > { %1646 = vmatmul.mubr.bf16.vlgmr.msra.gmra.mrb[0].mxu0 %v455_v10  ;;  %1775 = vmatmul.mubr.bf16.vlgmr.msra.gmra.mrb[0].mxu1 %v455_v10  ;;  %v3412_v10 = vld [vmem:[#allocation8 + $0x404] ss:$16 sps:$4 sm:$0xff]  }
  0xc9   : > { %1657 = vmatpush1.bf16.msra.mxu0 %v3314_v8  ;;  %1786 = vmatpush1.bf16.msra.mxu1 %v3317_v9  ;;  %v3404_v8 = vld [vmem:[#allocation8 + $0x3e0] ss:$16 sps:$4 sm:$0xff]   ;;  %v3407_v9 = vld [vmem:[#allocation8 + $0x3e8] ss:$16 sps:$4 sm:$0xff]  }
  0xca   : > { %1658 = vmatprep.subr.bf16.mxu0 %v3322_v11  ;;  %1787 = vmatprep.subr.bf16.mxu1 %v3325_v12  ;;  %v445_v11 = vld [vmem:[#allocation6 + $0x10] sm:$0xff]  ;;  %v451_v12 = vld [vmem:[#allocation6 + $0x40] sm:$0xff] }
  0xcb   : > { %1688 = vmatprep.mubr.bf16.mxu0 %v458_v37  ;;  %1817 = vmatprep.mubr.bf16.mxu1 %v458_v37  ;;  %v3445_v37 = vld [vmem:[#allocation8 + $0x4ac] ss:$16 sps:$4 sm:$0xff]  }
  0xcd   : > { %1659 = vmatpush1.bf16.msra.mxu0 %v3320_v13  ;;  %1788 = vmatpush1.bf16.msra.mxu1 %v3323_v14  ;;  %v3415_v13 = vld [vmem:[#allocation8 + $0x40c] ss:$16 sps:$4 sm:$0xff]   ;;  %v3410_v14 = vld [vmem:[#allocation8 + $0x400] ss:$16 sps:$4 sm:$0xff]  }
  0xce   : > { %1660 = vmatprep.subr.bf16.mxu0 %v3328_v15  ;;  %1789 = vmatprep.subr.bf16.mxu1 %v3331_v16  ;;  %v3413_v15 = vld [vmem:[#allocation8 + $0x408] ss:$16 sps:$4 sm:$0xff]   ;;  %v457_v16 = vpack.c.bf16 %v451_v12, %v445_v11  ;;  %v3502_v12 = vld [vmem:[#allocation8 + $0x5e4] ss:$16 sps:$4 sm:$0xff]  }
  0xcf   : > { %v3497_v11 = vld [vmem:[#allocation8 + $0x5c8] ss:$16 sps:$4 sm:$0xff]  }
  0xd1   : > { %1661 = vmatpush1.bf16.msra.mxu0 %v3326_v17  ;;  %1790 = vmatpush1.bf16.msra.mxu1 %v3329_v18  ;;  %v3418_v17 = vld [vmem:[#allocation8 + $0x424] ss:$16 sps:$4 sm:$0xff]   ;;  %v3421_v18 = vld [vmem:[#allocation8 + $0x42c] ss:$16 sps:$4 sm:$0xff]  }
  0xd2   : > { %1662 = vmatprep.subr.bf16.mxu0 %v3334_v19  ;;  %1791 = vmatprep.subr.bf16.mxu1 %v3337_v20  ;;  %v448_v19 = vld [vmem:[#allocation6 + $0x28] sm:$0xff]  ;;  %v454_v20 = vld [vmem:[#allocation6 + $0x58] sm:$0xff] }
  0xd5   : > { %1663 = vmatpush1.bf16.msra.mxu0 %v3332_v21  ;;  %1792 = vmatpush1.bf16.msra.mxu1 %v3335_v22  ;;  %v3416_v21 = vld [vmem:[#allocation8 + $0x420] ss:$16 sps:$4 sm:$0xff]   ;;  %v3419_v22 = vld [vmem:[#allocation8 + $0x428] ss:$16 sps:$4 sm:$0xff]  }
  0xd6   : > { %1664 = vmatprep.subr.bf16.mxu0 %v3340_v23  ;;  %1793 = vmatprep.subr.bf16.mxu1 %v3343_v24  ;;  %v460_v23 = vpack.c.bf16 %v454_v20, %v448_v19  ;;  %v3424_v24 = vld [vmem:[#allocation8 + $0x444] ss:$16 sps:$4 sm:$0xff]   ;;  %v3709_v19 = vmov 1966171168  }
  0xd7   : > { %v1920_v20 = vunpack.c.l.s4 %v3709_v19 }
  0xd9   : > { %1665 = vmatpush1.bf16.msra.mxu0 %v3338_v25  ;;  %1794 = vmatpush1.bf16.msra.mxu1 %v3341_v26  ;;  %v3427_v25 = vld [vmem:[#allocation8 + $0x44c] ss:$16 sps:$4 sm:$0xff]   ;;  %v3422_v26 = vld [vmem:[#allocation8 + $0x440] ss:$16 sps:$4 sm:$0xff]  }
  0xda   : > { %1666 = vmatprep.subr.bf16.mxu0 %v3346_v27  ;;  %1795 = vmatprep.subr.bf16.mxu1 %v3349_v28  ;;  %v3425_v27 = vld [vmem:[#allocation8 + $0x448] ss:$16 sps:$4 sm:$0xff]   ;;  %v3430_v28 = vld [vmem:[#allocation8 + $0x464] ss:$16 sps:$4 sm:$0xff]  }
  0xdd   : > { %1667 = vmatpush1.bf16.msra.mxu0 %v3344_v29  ;;  %1796 = vmatpush1.bf16.msra.mxu1 %v3347_v30  ;;  %v3433_v29 = vld [vmem:[#allocation8 + $0x46c] ss:$16 sps:$4 sm:$0xff]   ;;  %v3428_v30 = vld [vmem:[#allocation8 + $0x460] ss:$16 sps:$4 sm:$0xff]  }
  0xde   : > { %1668 = vmatprep.subr.bf16.mxu0 %v3352_v31  ;;  %1797 = vmatprep.subr.bf16.mxu1 %v3355_v32  ;;  %v3431_v31 = vld [vmem:[#allocation8 + $0x468] ss:$16 sps:$4 sm:$0xff]   ;;  %v3436_v32 = vld [vmem:[#allocation8 + $0x484] ss:$16 sps:$4 sm:$0xff]  }
  0xe1   : > { %1669 = vmatpush1.bf16.msra.mxu0 %v3350_v35  ;;  %1798 = vmatpush1.bf16.msra.mxu1 %v3353_v36  ;;  %v3437_v35 = vld [vmem:[#allocation8 + $0x488] ss:$16 sps:$4 sm:$0xff]   ;;  %v3442_v36 = vld [vmem:[#allocation8 + $0x4a4] ss:$16 sps:$4 sm:$0xff]  }
  0xe2   : > { %1670 = vmatprep.subr.bf16.mxu0 %v3358_v38  ;;  %1799 = vmatprep.subr.bf16.mxu1 %v3361_v39  ;;  %v3440_v38 = vld [vmem:[#allocation8 + $0x4a0] ss:$16 sps:$4 sm:$0xff]   ;;  %v3443_v39 = vld [vmem:[#allocation8 + $0x4a8] ss:$16 sps:$4 sm:$0xff]  }
  0xe5   : > { %1671 = vmatpush1.bf16.msra.mxu0 %v3356_v40  ;;  %1800 = vmatpush1.bf16.msra.mxu1 %v3359_v41  ;;  %v3448_v40 = vld [vmem:[#allocation8 + $0x4c4] ss:$16 sps:$4 sm:$0xff]   ;;  %v3451_v41 = vld [vmem:[#allocation8 + $0x4cc] ss:$16 sps:$4 sm:$0xff]  }
  0xe6   : > { %1672 = vmatprep.subr.bf16.mxu0 %v3364_v42  ;;  %1801 = vmatprep.subr.bf16.mxu1 %v3367_v43  ;;  %v3446_v42 = vld [vmem:[#allocation8 + $0x4c0] ss:$16 sps:$4 sm:$0xff]   ;;  %v3449_v43 = vld [vmem:[#allocation8 + $0x4c8] ss:$16 sps:$4 sm:$0xff]  }
  0xe9   : > { %1673 = vmatpush1.bf16.msra.mxu0 %v3362_v44  ;;  %1802 = vmatpush1.bf16.msra.mxu1 %v3365_v45  ;;  %v3454_v44 = vld [vmem:[#allocation8 + $0x4e4] ss:$16 sps:$4 sm:$0xff]   ;;  %v3457_v45 = vld [vmem:[#allocation8 + $0x4ec] ss:$16 sps:$4 sm:$0xff]  }
  0xea   : > { %1674 = vmatprep.subr.bf16.mxu0 %v3370_v46  ;;  %1803 = vmatprep.subr.bf16.mxu1 %v3373_v47  ;;  %v3452_v46 = vld [vmem:[#allocation8 + $0x4e0] ss:$16 sps:$4 sm:$0xff]   ;;  %v3455_v47 = vld [vmem:[#allocation8 + $0x4e8] ss:$16 sps:$4 sm:$0xff]  }
  0xed   : > { %1675 = vmatpush1.bf16.msra.mxu0 %v3368_v48  ;;  %1804 = vmatpush1.bf16.msra.mxu1 %v3371_v49  ;;  %v3460_v48 = vld [vmem:[#allocation8 + $0x504] ss:$16 sps:$4 sm:$0xff]   ;;  %v3463_v49 = vld [vmem:[#allocation8 + $0x50c] ss:$16 sps:$4 sm:$0xff]  }
  0xee   : > { %1676 = vmatprep.subr.bf16.mxu0 %v3376_v50  ;;  %1805 = vmatprep.subr.bf16.mxu1 %v3379_v51  ;;  %v3458_v50 = vld [vmem:[#allocation8 + $0x500] ss:$16 sps:$4 sm:$0xff]   ;;  %v3461_v51 = vld [vmem:[#allocation8 + $0x508] ss:$16 sps:$4 sm:$0xff]  }
  0xf1   : > { %1677 = vmatpush1.bf16.msra.mxu0 %v3374_v52  ;;  %1806 = vmatpush1.bf16.msra.mxu1 %v3377_v53  ;;  %v3466_v52 = vld [vmem:[#allocation8 + $0x524] ss:$16 sps:$4 sm:$0xff]   ;;  %v3469_v53 = vld [vmem:[#allocation8 + $0x52c] ss:$16 sps:$4 sm:$0xff]  }
  0xf2   : > { %1678 = vmatprep.subr.bf16.mxu0 %v3382_v54  ;;  %1807 = vmatprep.subr.bf16.mxu1 %v3385_v55  ;;  %v3464_v54 = vld [vmem:[#allocation8 + $0x520] ss:$16 sps:$4 sm:$0xff]   ;;  %v3467_v55 = vld [vmem:[#allocation8 + $0x528] ss:$16 sps:$4 sm:$0xff]  }
  0xf5   : > { %1679 = vmatpush1.bf16.msra.mxu0 %v3380_v56  ;;  %1808 = vmatpush1.bf16.msra.mxu1 %v3383_v57  ;;  %v3472_v56 = vld [vmem:[#allocation8 + $0x544] ss:$16 sps:$4 sm:$0xff]   ;;  %v3475_v57 = vld [vmem:[#allocation8 + $0x54c] ss:$16 sps:$4 sm:$0xff]  }
  0xf6   : > { %1680 = vmatprep.subr.bf16.mxu0 %v3388_v58  ;;  %1809 = vmatprep.subr.bf16.mxu1 %v3391_v59  ;;  %v3470_v58 = vld [vmem:[#allocation8 + $0x540] ss:$16 sps:$4 sm:$0xff]   ;;  %v3473_v59 = vld [vmem:[#allocation8 + $0x548] ss:$16 sps:$4 sm:$0xff]  }
  0xf9   : > { %1681 = vmatpush1.bf16.msra.mxu0 %v3386_v60  ;;  %1810 = vmatpush1.bf16.msra.mxu1 %v3389_v61  ;;  %v3478_v60 = vld [vmem:[#allocation8 + $0x564] ss:$16 sps:$4 sm:$0xff]   ;;  %v3481_v61 = vld [vmem:[#allocation8 + $0x56c] ss:$16 sps:$4 sm:$0xff]  }
  0xfa   : > { %1682 = vmatprep.subr.bf16.mxu0 %v3394_v62  ;;  %1811 = vmatprep.subr.bf16.mxu1 %v3397_v63  ;;  %v3476_v62 = vld [vmem:[#allocation8 + $0x560] ss:$16 sps:$4 sm:$0xff]   ;;  %v3479_v63 = vld [vmem:[#allocation8 + $0x568] ss:$16 sps:$4 sm:$0xff]  }
  0xfd   : > { %1683 = vmatpush1.bf16.msra.mxu0 %v3392_v0  ;;  %1812 = vmatpush1.bf16.msra.mxu1 %v3395_v1  ;;  %v3484_v0 = vld [vmem:[#allocation8 + $0x584] ss:$16 sps:$4 sm:$0xff]   ;;  %v3487_v1 = vld [vmem:[#allocation8 + $0x58c] ss:$16 sps:$4 sm:$0xff]  }
  0xfe   : > { %1684 = vmatprep.subr.bf16.mxu0 %v3400_v2  ;;  %1813 = vmatprep.subr.bf16.mxu1 %v3403_v3  ;;  %v3482_v2 = vld [vmem:[#allocation8 + $0x580] ss:$16 sps:$4 sm:$0xff]   ;;  %v3485_v3 = vld [vmem:[#allocation8 + $0x588] ss:$16 sps:$4 sm:$0xff]  }
 0x101   : > { %1685 = vmatpush1.bf16.msra.mxu0 %v3398_v4  ;;  %1814 = vmatpush1.bf16.msra.mxu1 %v3401_v5  ;;  %v3490_v4 = vld [vmem:[#allocation8 + $0x5a4] ss:$16 sps:$4 sm:$0xff]   ;;  %v3493_v5 = vld [vmem:[#allocation8 + $0x5ac] ss:$16 sps:$4 sm:$0xff]  }
 0x102   : > { %1686 = vmatprep.subr.bf16.mxu0 %v3406_v6  ;;  %1815 = vmatprep.subr.bf16.mxu1 %v3409_v7  ;;  %v3488_v6 = vld [vmem:[#allocation8 + $0x5a0] ss:$16 sps:$4 sm:$0xff]   ;;  %v3491_v7 = vld [vmem:[#allocation8 + $0x5a8] ss:$16 sps:$4 sm:$0xff]  }
 0x105   : > { %1687 = vmatpush1.bf16.msra.mxu0 %v3404_v8  ;;  %1816 = vmatpush1.bf16.msra.mxu1 %v3407_v9  ;;  %v3496_v8 = vld [vmem:[#allocation8 + $0x5c4] ss:$16 sps:$4 sm:$0xff]   ;;  %v3499_v9 = vld [vmem:[#allocation8 + $0x5cc] ss:$16 sps:$4 sm:$0xff]  }
 0x106   : > { %1699 = vmatprep.subr.bf16.mxu0 %v3412_v10  ;;  %1828 = vmatprep.subr.bf16.mxu1 %v3415_v13  ;;  %v3494_v10 = vld [vmem:[#allocation8 + $0x5c0] ss:$16 sps:$4 sm:$0xff]   ;;  %v3505_v13 = vld [vmem:[#allocation8 + $0x5ec] ss:$16 sps:$4 sm:$0xff]  }
 0x108   : > { %1689 = vmatmul.mubr.bf16.vlgmr.msra.gmra.mrb[0].mxu0 %v457_v16  ;;  %1818 = vmatmul.mubr.bf16.vlgmr.msra.gmra.mrb[0].mxu1 %v457_v16  ;;  %v447_v16 = vld [vmem:[#allocation6 + $0x20] sm:$0xff] }
 0x109   : > { %1700 = vmatpush1.bf16.msra.mxu0 %v3410_v14  ;;  %1829 = vmatpush1.bf16.msra.mxu1 %v3413_v15  ;;  %v3500_v14 = vld [vmem:[#allocation8 + $0x5e0] ss:$16 sps:$4 sm:$0xff]   ;;  %v3503_v15 = vld [vmem:[#allocation8 + $0x5e8] ss:$16 sps:$4 sm:$0xff]  }
 0x10a   : > { %1701 = vmatprep.subr.bf16.mxu0 %v3418_v17  ;;  %1830 = vmatprep.subr.bf16.mxu1 %v3421_v18  ;;  %v453_v17 = vld [vmem:[#allocation6 + $0x50] sm:$0xff] }
 0x10b   : > { %1731 = vmatprep.mubr.bf16.mxu0 %v460_v23  ;;  %1860 = vmatprep.mubr.bf16.mxu1 %v460_v23  ;;  %v459_v18 = vpack.c.bf16 %v453_v17, %v447_v16 }
 0x10d   : > { %1702 = vmatpush1.bf16.msra.mxu0 %v3416_v21  ;;  %1831 = vmatpush1.bf16.msra.mxu1 %v3419_v22  ;;  %v1922_v21 = vlaneseq  ;;  %v1921_v22 = vunpack.c.0.s8 %v1920_v20 }
 0x10e   : > { %1703 = vmatprep.subr.bf16.mxu0 %v3424_v24  ;;  %1832 = vmatprep.subr.bf16.mxu1 %v3427_v25 }
 0x10f   : > { %v1923_v23 = vshrl.u32 %v1922_v21, 7  ;;  %vm1945_vm0 = vcmp.lt.s32.totalorder %v1922_v21, 512 }
 0x111   : > { %1704 = vmatpush1.bf16.msra.mxu0 %v3422_v26  ;;  %1833 = vmatpush1.bf16.msra.mxu1 %v3425_v27 }
 0x112   : > { %1705 = vmatprep.subr.bf16.mxu0 %v3430_v28  ;;  %1834 = vmatprep.subr.bf16.mxu1 %v3433_v29  ;;  %v3902_v28 = vsub.s32 %v1921_v22, %v1923_v23 }
 0x115   : > { %1706 = vmatpush1.bf16.msra.mxu0 %v3428_v30  ;;  %1835 = vmatpush1.bf16.msra.mxu1 %v3431_v31 }
 0x116   : > { %1707 = vmatprep.subr.bf16.mxu0 %v3436_v32  ;;  %1836 = vmatprep.subr.bf16.mxu1 %v3439_v33 }
 0x119   : > { %1708 = vmatpush1.bf16.msra.mxu0 %v3434_v34  ;;  %1837 = vmatpush1.bf16.msra.mxu1 %v3437_v35 }
 0x11a   : > { %1709 = vmatprep.subr.bf16.mxu0 %v3442_v36  ;;  %1838 = vmatprep.subr.bf16.mxu1 %v3445_v37 }
 0x11d   : > { %1710 = vmatpush1.bf16.msra.mxu0 %v3440_v38  ;;  %1839 = vmatpush1.bf16.msra.mxu1 %v3443_v39 }
 0x11e   : > { %1711 = vmatprep.subr.bf16.mxu0 %v3448_v40  ;;  %1840 = vmatprep.subr.bf16.mxu1 %v3451_v41 }
 0x121   : > { %1712 = vmatpush1.bf16.msra.mxu0 %v3446_v42  ;;  %1841 = vmatpush1.bf16.msra.mxu1 %v3449_v43 }
 0x122   : > { %1713 = vmatprep.subr.bf16.mxu0 %v3454_v44  ;;  %1842 = vmatprep.subr.bf16.mxu1 %v3457_v45 }
 0x125   : > { %1714 = vmatpush1.bf16.msra.mxu0 %v3452_v46  ;;  %1843 = vmatpush1.bf16.msra.mxu1 %v3455_v47 }
 0x126   : > { %1715 = vmatprep.subr.bf16.mxu0 %v3460_v48  ;;  %1844 = vmatprep.subr.bf16.mxu1 %v3463_v49 }
 0x129   : > { %1716 = vmatpush1.bf16.msra.mxu0 %v3458_v50  ;;  %1845 = vmatpush1.bf16.msra.mxu1 %v3461_v51 }
 0x12a   : > { %1717 = vmatprep.subr.bf16.mxu0 %v3466_v52  ;;  %1846 = vmatprep.subr.bf16.mxu1 %v3469_v53 }
 0x12d   : > { %1718 = vmatpush1.bf16.msra.mxu0 %v3464_v54  ;;  %1847 = vmatpush1.bf16.msra.mxu1 %v3467_v55 }
 0x12e   : > { %1719 = vmatprep.subr.bf16.mxu0 %v3472_v56  ;;  %1848 = vmatprep.subr.bf16.mxu1 %v3475_v57 }
 0x131   : > { %1720 = vmatpush1.bf16.msra.mxu0 %v3470_v58  ;;  %1849 = vmatpush1.bf16.msra.mxu1 %v3473_v59 }
 0x132   : > { %1721 = vmatprep.subr.bf16.mxu0 %v3478_v60  ;;  %1850 = vmatprep.subr.bf16.mxu1 %v3481_v61 }
 0x135   : > { %1722 = vmatpush1.bf16.msra.mxu0 %v3476_v62  ;;  %1851 = vmatpush1.bf16.msra.mxu1 %v3479_v63 }
 0x136   : > { %1723 = vmatprep.subr.bf16.mxu0 %v3484_v0  ;;  %1852 = vmatprep.subr.bf16.mxu1 %v3487_v1 }
 0x139   : > { %1724 = vmatpush1.bf16.msra.mxu0 %v3482_v2  ;;  %1853 = vmatpush1.bf16.msra.mxu1 %v3485_v3 }
 0x13a   : > { %1725 = vmatprep.subr.bf16.mxu0 %v3490_v4  ;;  %1854 = vmatprep.subr.bf16.mxu1 %v3493_v5 }
 0x13d   : > { %1726 = vmatpush1.bf16.msra.mxu0 %v3488_v6  ;;  %1855 = vmatpush1.bf16.msra.mxu1 %v3491_v7 }
 0x13e   : > { %1727 = vmatprep.subr.bf16.mxu0 %v3496_v8  ;;  %1856 = vmatprep.subr.bf16.mxu1 %v3499_v9 }
 0x141   : > { %1728 = vmatpush1.bf16.msra.mxu0 %v3494_v10  ;;  %1857 = vmatpush1.bf16.msra.mxu1 %v3497_v11 }
 0x142   : > { %1729 = vmatprep.subr.bf16.mxu0 %v3502_v12  ;;  %1858 = vmatprep.subr.bf16.mxu1 %v3505_v13 }
 0x145   : > { %1730 = vmatpush1.bf16.msra.mxu0 %v3500_v14  ;;  %1859 = vmatpush1.bf16.msra.mxu1 %v3503_v15 }
 0x148   : > { %1732 = vmatmul.mubr.bf16.vlgmr.msra.gmra.mrb[0].mxu0 %v459_v18  ;;  %1861 = vmatmul.mubr.bf16.vlgmr.msra.gmra.mrb[0].mxu1 %v459_v18 }
 0x21b   : > { %v1733_v24 = vpop.f32.mrb[0].mxu0  ;;  %v1862_v25 = vpop.f32.mrb[0].mxu1 }
 0x21c   : > { %1876 = vst [vmem:[#allocation2] sm:$0xff] %v1733_v24  ;;  %1878 = vst [vmem:[#allocation2 + $0x10] sm:$0xff] %v1862_v25  ;;  %v1735_v26 = vpop.f32.mrb[1].mxu0  ;;  %v1864_v27 = vpop.f32.mrb[1].mxu1  ;;  %v1950_v29 = vmul.f32 %v1733_v24, %v1733_v24  ;;  %v1952_v30 = vmul.f32 %v1862_v25, %v1862_v25 }
 0x21d   : > { %1877 = vst [vmem:[#allocation2 + $0x8] sm:$0xff] %v1735_v26  ;;  %v1951_v31 = vmul.f32 %v1735_v26, %v1735_v26  ;;  %1879 = vst [vmem:[#allocation2 + $0x18] sm:$0xff] %v1864_v27  ;;  %v1953_v32 = vmul.f32 %v1864_v27, %v1864_v27  ;;  %v1737_v33 = vpop.f32.mrb[2].mxu0  ;;  %v1866_v34 = vpop.f32.mrb[2].mxu1 }
 0x21e   : > { %1880 = vst [vmem:[#allocation2 + $0x20] sm:$0xff] %v1737_v33  ;;  %v1885_v35 = vadd.f32 %v1737_v33, %v1733_v24  ;;  %v1954_v36 = vmul.f32 %v1737_v33, %v1737_v33  ;;  %1882 = vst [vmem:[#allocation2 + $0x30] sm:$0xff] %v1866_v34  ;;  %v1899_v37 = vadd.f32 %v1866_v34, %v1862_v25  ;;  %v1739_v39 = vpop.f32.mrb[3].mxu0  ;;  %v1868_v40 = vpop.f32.mrb[3].mxu1 }
 0x21f   : > { %v1956_v38 = vmul.f32 %v1866_v34, %v1866_v34  ;;  %1881 = vst [vmem:[#allocation2 + $0x28] sm:$0xff] %v1739_v39  ;;  %v1892_v41 = vadd.f32 %v1739_v39, %v1735_v26  ;;  %v1955_v42 = vmul.f32 %v1739_v39, %v1739_v39  ;;  %1883 = vst [vmem:[#allocation2 + $0x38] sm:$0xff] %v1868_v40 }
 0x220   : > { %v1906_v43 = vadd.f32 %v1868_v40, %v1864_v27  ;;  %v1957_v44 = vmul.f32 %v1868_v40, %v1868_v40  ;;  %v1886_v45 = vrot.slane %v1885_v35, 4  ;;  %v1958_v46 = vadd.f32 %v1954_v36, %v1950_v29 }
 0x221   : > { %v1900_v47 = vrot.slane %v1899_v37, 4  ;;  %v1972_v48 = vadd.f32 %v1956_v38, %v1952_v30  ;;  %v1893_v49 = vrot.slane %v1892_v41, 4  ;;  %v1965_v50 = vadd.f32 %v1955_v42, %v1951_v31 }
 0x222   : > { %v1907_v51 = vrot.slane %v1906_v43, 4  ;;  %v1979_v52 = vadd.f32 %v1957_v44, %v1953_v32  ;;  %v1887_v53 = vadd.f32 %v1886_v45, %v1885_v35  ;;  %v1959_v54 = vrot.slane %v1958_v46, 4  ;;  %v1884_v44 = vld [vmem:[#allocation4] ss:$2 sm:$0xf] }
 0x223   : > { %v1901_v55 = vadd.f32 %v1900_v47, %v1899_v37  ;;  %v1973_v56 = vrot.slane %v1972_v48, 4  ;;  %v1894_v57 = vadd.f32 %v1893_v49, %v1892_v41  ;;  %v1966_v58 = vrot.slane %v1965_v50, 4  ;;  %v1949_v47 = vld [vmem:[#allocation4 + $0x1] ss:$2 sm:$0xf] }
 0x224   : > { %v1908_v59 = vadd.f32 %v1907_v51, %v1906_v43  ;;  %v1980_v60 = vrot.slane %v1979_v52, 4  ;;  %v1888_v61 = vrot.slane %v1887_v53, 2  ;;  %v1960_v62 = vadd.f32 %v1959_v54, %v1958_v46 }
 0x225   : > { %v1902_v63 = vrot.slane %v1901_v55, 2  ;;  %v1974_v0 = vadd.f32 %v1973_v56, %v1972_v48  ;;  %v1895_v1 = vrot.slane %v1894_v57, 2  ;;  %v1967_v2 = vadd.f32 %v1966_v58, %v1965_v50 }
 0x226   : > { %v1909_v3 = vrot.slane %v1908_v59, 2  ;;  %v1981_v4 = vadd.f32 %v1980_v60, %v1979_v52  ;;  %v1889_v5 = vadd.f32 %v1888_v61, %v1887_v53  ;;  %v1961_v6 = vrot.slane %v1960_v62, 2 }
 0x227   : > { %v1903_v7 = vadd.f32 %v1902_v63, %v1901_v55  ;;  %v1975_v8 = vrot.slane %v1974_v0, 2  ;;  %v1896_v9 = vadd.f32 %v1895_v1, %v1894_v57  ;;  %v1968_v10 = vrot.slane %v1967_v2, 2 }
 0x228   : > { %v1910_v11 = vadd.f32 %v1909_v3, %v1908_v59  ;;  %v1982_v12 = vrot.slane %v1981_v4, 2  ;;  %v1890_v13 = vrot.slane %v1889_v5, 1  ;;  %v1962_v14 = vadd.f32 %v1961_v6, %v1960_v62 }
 0x229   : > { %v1904_v15 = vrot.slane %v1903_v7, 1  ;;  %v1976_v16 = vadd.f32 %v1975_v8, %v1974_v0  ;;  %v1897_v17 = vrot.slane %v1896_v9, 1  ;;  %v1969_v18 = vadd.f32 %v1968_v10, %v1967_v2 }
 0x22a   : > { %v1911_v19 = vrot.slane %v1910_v11, 1  ;;  %v1983_v20 = vadd.f32 %v1982_v12, %v1981_v4  ;;  %v1891_v22 = vadd.f32 %v1890_v13, %v1889_v5  ;;  %v1963_v23 = vrot.slane %v1962_v14, 1 }
 0x22b   : > { %v1905_v24 = vadd.f32 %v1904_v15, %v1903_v7  ;;  %v1977_v25 = vrot.slane %v1976_v16, 1  ;;  %v1898_v26 = vadd.f32 %v1897_v17, %v1896_v9  ;;  %v1970_v27 = vrot.slane %v1969_v18, 1 }
 0x22c   : > { %v1912_v29 = vadd.f32 %v1911_v19, %v1910_v11  ;;  %v1984_v30 = vrot.slane %v1983_v20, 1  ;;  %v1964_v31 = vadd.f32 %v1963_v23, %v1962_v14 }
 0x22d   : > { %v1978_v32 = vadd.f32 %v1977_v25, %v1976_v16  ;;  %v1917_v33 = vcombine.low %v1891_v22, %v1898_v26  ;;  %v1971_v34 = vadd.f32 %v1970_v27, %v1969_v18 }
 0x22e   : > { %v1918_v35 = vcombine.low %v1905_v24, %v1912_v29  ;;  %v1985_v36 = vadd.f32 %v1984_v30, %v1983_v20 }
 0x22f   : > { %v1925_v37 = vrot.slane %v1917_v33, %v3902_v28  ;;  %v1990_v38 = vcombine.low %v1964_v31, %v1971_v34 }
 0x230   : > { %v1932_v39 = vrot.slane %v1918_v35, %v3902_v28  ;;  %v1991_v40 = vcombine.low %v1978_v32, %v1985_v36 }
 0x231   : > { %v1998_v41 = vrot.slane %v1990_v38, %v3902_v28 }
 0x232   : > { %v1933_v42 = vcombine.low %v1925_v37, %v1932_v39  ;;  %v2005_v43 = vrot.slane %v1991_v40, %v3902_v28 }
 0x234   : > { %v1940_v45 = vrot.slane %v1933_v42, %v3902_v28  ;;  %v2006_v46 = vcombine.low %v1998_v41, %v2005_v43 }
 0x236   : > { %v1942_v48 = vadd.f32 %v1940_v45, %v1884_v44  ;;  %v2013_v49 = vrot.slane %v2006_v46, %v3902_v28 }
 0x238   : > { %1947 = vst.msk [vmem:[#allocation4] ss:$2 sm:$0xf] %vm1945_vm0, %v1942_v48  ;;  %v2015_v50 = vadd.f32 %v2013_v49, %v1949_v47 }
 0x23a   : > { %2016 = vst.msk [vmem:[#allocation4 + $0x1] ss:$2 sm:$0xf] %vm1945_vm0, %v2015_v50 }
 0x23b PF: > { %p3004_p3 = scmp.ne.s32.totalorder %s3688_s30, 1 }
 0x23c   : > { %v3506_v51 = vld [vmem:[#allocation10 + $0x40] sm:$0xff] (!%p3004_p3)   ;;  %v3510_v55 = vld [vmem:[#allocation10 + $0x48] sm:$0xff] (!%p3004_p3)   ;;  %v3514_v57 = vld [vmem:[#allocation10 + $0x50] sm:$0xff] (!%p3004_p3)   ;;  %v2049_v25 = vlaneseq (!%p3004_p3) }
 0x23d   : > { %2020 = sbr.rel (%p3004_p3) target bundleno = 857 (0x359), region = 84  ;;  %v3507_v52 = vld [vmem:[#allocation10 + $0xc0] sm:$0xff] (!%p3004_p3)   ;;  %3052 = vmatprep.subr.bf16.mxu0 (!%p3004_p3), %v3506_v51  ;;  %v3511_v21 = vld [vmem:[#allocation10 + $0xc8] sm:$0xff] (!%p3004_p3)   ;;  %v3515_v58 = vld [vmem:[#allocation10 + $0xd0] sm:$0xff] (!%p3004_p3)  }
 0x23e   : > { %v3508_v53 = vld [vmem:[#allocation10] sm:$0xff] (!%p3004_p3)   ;;  %3074 = vmatprep.subr.bf16.mxu1 (!%p3004_p3), %v3507_v52  ;;  %v3512_v56 = vld [vmem:[#allocation10 + $0x8] sm:$0xff] (!%p3004_p3)   ;;  %v3516_v59 = vld [vmem:[#allocation10 + $0x10] sm:$0xff] (!%p3004_p3)   ;;  %v2050_v26 = vshrl.u32 (!%p3004_p3), %v2049_v25, 7 }
 0x23f   : > { %v3509_v54 = vld [vmem:[#allocation10 + $0x80] sm:$0xff] (!%p3004_p3)   ;;  %3053 = vmatpush3.bf16.msra.mxu0 (!%p3004_p3), %v3508_v53  ;;  %v3513_v28 = vld [vmem:[#allocation10 + $0x88] sm:$0xff] (!%p3004_p3)   ;;  %v3517_v60 = vld [vmem:[#allocation10 + $0x90] sm:$0xff] (!%p3004_p3)  }
 0x240   : > { %3075 = vmatpush3.bf16.msra.mxu1 (!%p3004_p3), %v3509_v54  ;;  %3054 = vmatprep.subr.bf16.mxu0 (!%p3004_p3), %v3510_v55  ;;  %v3518_v61 = vld [vmem:[#allocation10 + $0x58] sm:$0xff] (!%p3004_p3)   ;;  %v3522_v1 = vld [vmem:[#allocation10 + $0x60] sm:$0xff] (!%p3004_p3)   ;;  %v3526_v5 = vld [vmem:[#allocation10 + $0x68] sm:$0xff] (!%p3004_p3)   ;;  %v2055_v29 = vsub.s32 (!%p3004_p3), 1, %v2050_v26  ;;  %v2063_v30 = vsub.s32 (!%p3004_p3), 3, %v2050_v26  ;;  %v2051_v31 = vsub.s32 (!%p3004_p3), 0, %v2050_v26 }
 0x241   : > { %3076 = vmatprep.subr.bf16.mxu1 (!%p3004_p3), %v3511_v21  ;;  %v3519_v62 = vld [vmem:[#allocation10 + $0xd8] sm:$0xff] (!%p3004_p3)   ;;  %v3523_v2 = vld [vmem:[#allocation10 + $0xe0] sm:$0xff] (!%p3004_p3)   ;;  %v3527_v6 = vld [vmem:[#allocation10 + $0xe8] sm:$0xff] (!%p3004_p3)   ;;  %v2059_v33 = vsub.s32 (!%p3004_p3), 2, %v2050_v26 }
 0x242   : > { %v3520_v63 = vld [vmem:[#allocation10 + $0x18] sm:$0xff] (!%p3004_p3)   ;;  %v3524_v3 = vld [vmem:[#allocation10 + $0x20] sm:$0xff] (!%p3004_p3)   ;;  %v3528_v7 = vld [vmem:[#allocation10 + $0x28] sm:$0xff] (!%p3004_p3)  }
 0x243   : > { %3055 = vmatpush3.bf16.msra.mxu0 (!%p3004_p3), %v3512_v56  ;;  %v3521_v0 = vld [vmem:[#allocation10 + $0x98] sm:$0xff] (!%p3004_p3)   ;;  %v3525_v4 = vld [vmem:[#allocation10 + $0xa0] sm:$0xff] (!%p3004_p3)   ;;  %v3529_v8 = vld [vmem:[#allocation10 + $0xa8] sm:$0xff] (!%p3004_p3)  }
 0x244   : > { %3077 = vmatpush3.bf16.msra.mxu1 %v3513_v28  ;;  %3056 = vmatprep.subr.bf16.mxu0 %v3514_v57  ;;  %v3530_v9 = vld [vmem:[#allocation10 + $0x70] sm:$0xff]   ;;  %v3534_v13 = vld [vmem:[#allocation10 + $0x78] sm:$0xff]   ;;  %v2030_v27 = vld [vmem:[%s3948_s5] sm:$0xf] }
 0x245   : > { %3078 = vmatprep.subr.bf16.mxu1 %v3515_v58  ;;  %v3531_v10 = vld [vmem:[#allocation10 + $0xf0] sm:$0xff]   ;;  %v3535_v14 = vld [vmem:[#allocation10 + $0xf8] sm:$0xff]   ;;  %v2032_v35 = vld [vmem:[%s3949_s6] sm:$0xf] }
 0x246   : > { %v3532_v11 = vld [vmem:[#allocation10 + $0x30] sm:$0xff]   ;;  %v3536_v15 = vld [vmem:[#allocation10 + $0x38] sm:$0xff]   ;;  %v2040_v43 = vld [vmem:[#allocation2] sm:$0xff] }
 0x247   : > { %3057 = vmatpush3.bf16.msra.mxu0 %v3516_v59  ;;  %v3533_v12 = vld [vmem:[#allocation10 + $0xb0] sm:$0xff]   ;;  %v3537_v16 = vld [vmem:[#allocation10 + $0xb8] sm:$0xff]   ;;  %v2044_v44 = vld [vmem:[#allocation2 + $0x20] sm:$0xff] }
 0x248   : > { %3079 = vmatpush3.bf16.msra.mxu1 %v3517_v60  ;;  %3058 = vmatprep.subr.bf16.mxu0 %v3518_v61  ;;  %v2021_v17 = vld [vmem:[#allocation4] ss:$2 sm:$0xf]  ;;  %v2024_v18 = vld [vmem:[#allocation4 + $0x1] ss:$2 sm:$0xf] }
 0x249   : > { %3080 = vmatprep.subr.bf16.mxu1 %v3519_v62  ;;  %v2022_v19 = vmul.f32 0.0625, %v2021_v17  ;;  %v2025_v20 = vmul.f32 0.0625, %v2024_v18  ;;  %v2041_v36 = vld [vmem:[#allocation2 + $0x8] sm:$0xff]  ;;  %v2043_v38 = vld [vmem:[#allocation2 + $0x18] sm:$0xff]  ;;  %v2042_v46 = vld [vmem:[#allocation2 + $0x10] sm:$0xff] }
 0x24a   : > { %v2045_v37 = vld [vmem:[#allocation2 + $0x28] sm:$0xff]  ;;  %v2047_v39 = vld [vmem:[#allocation2 + $0x38] sm:$0xff]  ;;  %v2046_v47 = vld [vmem:[#allocation2 + $0x30] sm:$0xff] }
 0x24b   : > { %3059 = vmatpush3.bf16.msra.mxu0 %v3520_v63  ;;  %v2026_v22 = vmul.f32 %v2022_v19, %v2022_v19 }
 0x24c   : > { %3081 = vmatpush3.bf16.msra.mxu1 %v3521_v0  ;;  %3060 = vmatprep.subr.bf16.mxu0 %v3522_v1 }
 0x24d   : > { %3082 = vmatprep.subr.bf16.mxu1 %v3523_v2  ;;  %v2027_v23 = vsub.f32 %v2025_v20, %v2026_v22 }
 0x24f   : > { %3061 = vmatpush3.bf16.msra.mxu0 %v3524_v3  ;;  %v2028_v24 = vadd.f32 1e-05, %v2027_v23 }
 0x250   : > { %3083 = vmatpush3.bf16.msra.mxu1 %v3525_v4  ;;  %3062 = vmatprep.subr.bf16.mxu0 %v3526_v5 }
 0x251   : > { %3084 = vmatprep.subr.bf16.mxu1 %v3527_v6  ;;  %3538 = vrsqrt.f32 %v2028_v24 }
 0x253   : > { %3063 = vmatpush3.bf16.msra.mxu0 %v3528_v7 }
 0x254   : > { %3085 = vmatpush3.bf16.msra.mxu1 %v3529_v8  ;;  %3064 = vmatprep.subr.bf16.mxu0 %v3530_v9 }
 0x255   : > { %3086 = vmatprep.subr.bf16.mxu1 %v3531_v10 }
 0x257   : > { %3065 = vmatpush3.bf16.msra.mxu0 %v3532_v11 }
 0x258   : > { %3087 = vmatpush3.bf16.msra.mxu1 %v3533_v12  ;;  %3066 = vmatprep.subr.bf16.mxu0 %v3534_v13 }
 0x259   : > { %3088 = vmatprep.subr.bf16.mxu1 %v3535_v14 }
 0x25b   : > { %3067 = vmatpush3.bf16.msra.mxu0 %v3536_v15  ;;  %v3539_v32 = vpop.eup %3538 }
 0x25c   : > { %3089 = vmatpush3.bf16.msra.mxu1 %v3537_v16  ;;  %v2031_v34 = vmul.f32 %v3539_v32, %v2030_v27 }
 0x25e   : > { %v2033_v40 = vmul.f32 %v2031_v34, %v2022_v19  ;;  %v2056_v41 = vrot.slane %v2031_v34, %v2055_v29  ;;  %v2064_v42 = vrot.slane %v2031_v34, %v2063_v30  ;;  %v2052_v45 = vrot.slane %v2031_v34, %v2051_v31 }
 0x25f   : > { %v2060_v48 = vrot.slane %v2031_v34, %v2059_v33 }
 0x260   : > { %v2034_v49 = vsub.f32 %v2032_v35, %v2033_v40  ;;  %v2070_v50 = vmul.f32 %v2056_v41, %v2041_v36  ;;  %v2074_v51 = vmul.f32 %v2056_v41, %v2045_v37  ;;  %v2072_v52 = vmul.f32 %v2064_v42, %v2043_v38 }
 0x261   : > { %v2076_v53 = vmul.f32 %v2064_v42, %v2047_v39  ;;  %v2069_v54 = vmul.f32 %v2052_v45, %v2040_v43  ;;  %v2073_v55 = vmul.f32 %v2052_v45, %v2044_v44  ;;  %v2071_v21 = vmul.f32 %v2060_v48, %v2042_v46  ;;  %v2502_v45 = vld [vmem:[#allocation5] sm:$0x1] }
 0x262   : > { %v2085_v56 = vrot.slane %v2034_v49, %v2055_v29  ;;  %v2093_v28 = vrot.slane %v2034_v49, %v2063_v30  ;;  %v2081_v57 = vrot.slane %v2034_v49, %v2051_v31  ;;  %v2075_v58 = vmul.f32 %v2060_v48, %v2046_v47  ;;  %v2512_v48 = vld [vmem:[#allocation5 + $0x1] sm:$0x1] }
 0x263   : > { %v2089_v59 = vrot.slane %v2034_v49, %v2059_v33 }
 0x264   : > { %v2099_v60 = vadd.f32 %v2085_v56, %v2070_v50  ;;  %v2103_v61 = vadd.f32 %v2085_v56, %v2074_v51  ;;  %v2101_v62 = vadd.f32 %v2093_v28, %v2072_v52  ;;  %v2105_v63 = vadd.f32 %v2093_v28, %v2076_v53 }
 0x265   : > { %v2098_v0 = vadd.f32 %v2081_v57, %v2069_v54  ;;  %v2102_v1 = vadd.f32 %v2081_v57, %v2073_v55  ;;  %v2100_v2 = vadd.f32 %v2089_v59, %v2071_v21  ;;  %v2104_v3 = vadd.f32 %v2089_v59, %v2075_v58 }
 0x266   : > { %v2107_v4 = vmax.f32 %v2099_v60, 0.0  ;;  %v2111_v5 = vmax.f32 %v2103_v61, 0.0  ;;  %v2109_v6 = vmax.f32 %v2101_v62, 0.0  ;;  %v2113_v7 = vmax.f32 %v2105_v63, 0.0 }
 0x267   : > { %v2106_v8 = vmax.f32 %v2098_v0, 0.0  ;;  %v2110_v9 = vmax.f32 %v2102_v1, 0.0  ;;  %v2108_v10 = vmax.f32 %v2100_v2, 0.0  ;;  %v2112_v11 = vmax.f32 %v2104_v3, 0.0 }
 0x268   : > { %v2115_v12 = vpack.c.bf16 %v2111_v5, %v2107_v4  ;;  %v2117_v13 = vpack.c.bf16 %v2113_v7, %v2109_v6 }
 0x269   : > { %v2114_v14 = vpack.c.bf16 %v2110_v9, %v2106_v8  ;;  %v2116_v15 = vpack.c.bf16 %v2112_v11, %v2108_v10 }
 0x26a   : > { %2406 = vmatprep.mubr.bf16.mxu0 %v2115_v12  ;;  %2447 = vmatprep.mubr.bf16.mxu1 %v2117_v13 }
 0x26b   : > { %2407 = vmatmul.mubr.bf16.vlgmr.msra.gmra.mrb[0].mxu0 %v2114_v14  ;;  %2448 = vmatmul.mubr.bf16.vlgmr.msra.gmra.mrb[0].mxu1 %v2116_v15 }
 0x33e   : > { %v3068_v16 = vpop.f32.mrb[0].mxu0  ;;  %v3090_v17 = vpop.f32.mrb[0].mxu1 }
 0x33f   : > { %v3069_v18 = vpop.f32.mrb[1].mxu0  ;;  %v3091_v19 = vpop.f32.mrb[1].mxu1 }
 0x340   : > { %v3070_v20 = vadd.f32 %v3069_v18, %v3068_v16  ;;  %v3092_v22 = vadd.f32 %v3091_v19, %v3090_v17  ;;  %v3071_v23 = vpop.f32.mrb[2].mxu0  ;;  %v3093_v24 = vpop.f32.mrb[2].mxu1 }
 0x341   : > { %v3072_v25 = vpop.f32.mrb[3].mxu0  ;;  %v3094_v26 = vpop.f32.mrb[3].mxu1 }
 0x342   : > { %v2450_v27 = vadd.f32 %v3092_v22, %v3070_v20  ;;  %v3073_v29 = vadd.f32 %v3072_v25, %v3071_v23  ;;  %v3095_v30 = vadd.f32 %v3094_v26, %v3093_v24 }
 0x344   : > { %2457 = vst [vmem:[#allocation3] sm:$0xff] %v2450_v27  ;;  %v2453_v31 = vadd.f32 %v3095_v30, %v3073_v29  ;;  %v2513_v32 = vmul.f32 %v2450_v27, %v2450_v27 }
 0x346   : > { %2458 = vst [vmem:[#allocation3 + $0x8] sm:$0xff] %v2453_v31  ;;  %v2503_v33 = vadd.f32 %v2453_v31, %v2450_v27  ;;  %v2514_v34 = vmul.f32 %v2453_v31, %v2453_v31 }
 0x348   : > { %v2504_v35 = vrot.slane %v2503_v33, 4  ;;  %v2515_v36 = vadd.f32 %v2514_v34, %v2513_v32 }
 0x34a   : > { %v2505_v37 = vadd.f32 %v2504_v35, %v2503_v33  ;;  %v2516_v38 = vrot.slane %v2515_v36, 4 }
 0x34c   : > { %v2506_v39 = vrot.slane %v2505_v37, 2  ;;  %v2517_v40 = vadd.f32 %v2516_v38, %v2515_v36 }
 0x34e   : > { %v2507_v41 = vadd.f32 %v2506_v39, %v2505_v37  ;;  %v2518_v42 = vrot.slane %v2517_v40, 2 }
 0x350   : > { %v2508_v43 = vrot.slane %v2507_v41, 1  ;;  %v2519_v44 = vadd.f32 %v2518_v42, %v2517_v40 }
 0x352   : > { %v2509_v46 = vadd.f32 %v2508_v43, %v2507_v41  ;;  %v2520_v47 = vrot.slane %v2519_v44, 1 }
 0x354   : > { %v2510_v49 = vadd.f32 %v2509_v46, %v2502_v45  ;;  %v2521_v50 = vadd.f32 %v2520_v47, %v2519_v44 }
 0x356   : > { %2511 = vst [vmem:[#allocation5] sm:$0x1] %v2510_v49  ;;  %v2522_v51 = vadd.f32 %v2521_v50, %v2512_v48 }
 0x358   : > { %2523 = vst [vmem:[#allocation5 + $0x1] sm:$0x1] %v2522_v51 }
 0x359 PF: > { %p3037_p11 = scmp.ne.s32.totalorder %s3688_s30, 2 }
 0x35a   : > { %v3540_v52 = vld [vmem:[#allocation11] sm:$0xff] (!%p3037_p11)   ;;  %v3710_v53 = vmov (!%p3037_p11), 0.0   ;;  %v3541_v54 = vld [vmem:[#allocation11 + $0x8] sm:$0xff] (!%p3037_p11)   ;;  %vm3711_vm1 = vmmov (!%p3037_p11), 0   ;;  %v3542_v55 = vld [vmem:[#allocation11 + $0x10] sm:$0xff] (!%p3037_p11)   ;;  %v2544_v0 = vlaneseq (!%p3037_p11)  ;;  %vm2675_vm2 = vcmask (!%p3037_p11), 64512  }
 0x35b   : > { %2527 = sbr.rel (%p3037_p11) target bundleno = 1112 (0x458), region = 96  ;;  %3105 = vmatprep.subr.bf16.mxu0 (!%p3037_p11), %v3710_v53  ;;  %3121 = vmatprep.mubr.msk.bf16.mxu0 (!%p3037_p11), %vm3711_vm1, %v3710_v53  ;;  %v3543_v58 = vld [vmem:[#allocation11 + $0x18] sm:$0xff] (!%p3037_p11)   ;;  %v3544_v61 = vld [vmem:[#allocation11 + $0x20] sm:$0xff] (!%p3037_p11)   ;;  %v3545_v63 = vld [vmem:[#allocation11 + $0x28] sm:$0xff] (!%p3037_p11)  }
 0x35c   : > { %3106 = vmatpush3.bf16.msra.mxu0 (!%p3037_p11), %v3540_v52  ;;  %v3546_v1 = vld [vmem:[#allocation11 + $0x30] sm:$0xff] (!%p3037_p11)   ;;  %v2545_v2 = vshrl.u32 (!%p3037_p11), %v2544_v0, 7  ;;  %v2536_v3 = vld [vmem:[%s3950_s7] sm:$0x1] (!%p3037_p11)  ;;  %v3547_v4 = vld [vmem:[#allocation11 + $0x38] sm:$0xff] (!%p3037_p11)  }
 0x35d   : > { %3107 = vmatprep.subr.bf16.mxu0 (!%p3037_p11), %v3710_v53  ;;  %v2528_v21 = vld [vmem:[#allocation5] sm:$0x1] (!%p3037_p11)  ;;  %v2538_v8 = vld [vmem:[%s3951_s8] sm:$0x1] (!%p3037_p11)  ;;  %v2543_v10 = vld [vmem:[#allocation3 + $0x8] sm:$0xff] (!%p3037_p11) }
 0x35e   : > { %v2529_v28 = vmul.f32 (!%p3037_p11), 0.0625, %v2528_v21  ;;  %v2546_v5 = vsub.s32 (!%p3037_p11), 0, %v2545_v2  ;;  %v2542_v9 = vld [vmem:[#allocation3] sm:$0xff] (!%p3037_p11) }
 0x35f   : > { %v2530_v56 = vld [vmem:[#allocation5 + $0x1] sm:$0x1] (!%p3037_p11)  ;;  %v3046_v23 = vld [vmem:[%s3947_s4] ss:$0 sm:$0xff] (!%p3037_p11) }
 0x360   : > { %3108 = vmatpush3.bf16.msra.mxu0 (!%p3037_p11), %v3541_v54  ;;  %v2531_v57 = vmul.f32 (!%p3037_p11), 0.0625, %v2530_v56  ;;  %v2532_v59 = vmul.f32 (!%p3037_p11), %v2529_v28, %v2529_v28 }
 0x361   : > { %3109 = vmatprep.subr.bf16.mxu0 (!%p3037_p11), %v3710_v53 }
 0x362   : > { %v2533_v60 = vsub.f32 %v2531_v57, %v2532_v59 }
 0x364   : > { %3110 = vmatpush3.bf16.msra.mxu0 %v3542_v55  ;;  %v2534_v62 = vadd.f32 1e-05, %v2533_v60 }
 0x365   : > { %3111 = vmatprep.subr.bf16.mxu0 %v3710_v53 }
 0x366   : > { %3548 = vrsqrt.f32 %v2534_v62 }
 0x368   : > { %3112 = vmatpush3.bf16.msra.mxu0 %v3543_v58 }
 0x369   : > { %3113 = vmatprep.subr.bf16.mxu0 %v3710_v53 }
 0x36c   : > { %3114 = vmatpush3.bf16.msra.mxu0 %v3544_v61 }
 0x36d   : > { %3115 = vmatprep.subr.bf16.mxu0 %v3710_v53 }
 0x370   : > { %3116 = vmatpush3.bf16.msra.mxu0 %v3545_v63  ;;  %v3549_v6 = vpop.eup %3548 }
 0x371   : > { %3117 = vmatprep.subr.bf16.mxu0 %v3710_v53  ;;  %v2537_v7 = vmul.f32 %v3549_v6, %v2536_v3 }
 0x373   : > { %v2539_v11 = vmul.f32 %v2537_v7, %v2529_v28  ;;  %v2547_v12 = vrot.slane %v2537_v7, %v2546_v5 }
 0x374   : > { %3118 = vmatpush3.bf16.msra.mxu0 %v3546_v1 }
 0x375   : > { %3119 = vmatprep.subr.bf16.mxu0 %v3710_v53  ;;  %v2540_v13 = vsub.f32 %v2538_v8, %v2539_v11  ;;  %v2548_v14 = vmul.f32 %v2547_v12, %v2542_v9  ;;  %v2549_v15 = vmul.f32 %v2547_v12, %v2543_v10 }
 0x377   : > { %v2554_v16 = vrot.slane %v2540_v13, %v2546_v5 }
 0x378   : > { %3120 = vmatpush3.bf16.msra.mxu0 %v3547_v4 }
 0x379   : > { %v2556_v17 = vadd.f32 %v2554_v16, %v2548_v14  ;;  %v2557_v18 = vadd.f32 %v2554_v16, %v2549_v15 }
 0x37b   : > { %v2558_v19 = vmax.f32 %v2556_v17, 0.0  ;;  %v2559_v20 = vmax.f32 %v2557_v18, 0.0 }
 0x37d   : > { %v2560_v22 = vpack.c.bf16 %v2559_v20, %v2558_v19 }
 0x37f   : > { %3122 = vmatmul.mubr.bf16.vlgmr.msra.gmra.mrb[0].mxu0 %v2560_v22 }
 0x452   : > { %v2659_v24 = vpop.f32.mrb[0].mxu0 }
 0x453   : > { %v2673_v25 = vadd.f32 %v3046_v23, %v2659_v24  ;;  %v3123_v26 = vpop.f32.mrb[1].mxu0 }
 0x454   : > { %v2662_v27 = vpop.f32.mrb[2].mxu0 }
 0x455   : > { %2676 = vst.msk [vmem:[%s3952_s9] sm:$0xff] %vm2675_vm2, %v2673_v25  ;;  %v2674_v29 = vadd.f32 %v3046_v23, %v2662_v27  ;;  %v3124_v30 = vpop.f32.mrb[3].mxu0 }
 0x457   : > { %2677 = vst.msk [vmem:[%s3952_s9 + $0x8] sm:$0xff] %vm2675_vm2, %v2674_v29 }
 0x458 PF: > { %s24_s11 = sadd.s32 1, %s3696_s11   ;;  %s3967_s30 = smov %s3692_s10 }
 0x459   : > { %p21_p12 = scmp.ge.s32.totalorder %s24_s11, 5   ;;  %s3968_s10 = smov %s3970_s13 }
 0x45b   :  { %23 = sbr.rel (!%p21_p12) target bundleno = 7 (0x7), region = 138 }
 0x462   :  { %2706 = vsyncpa [#allocation7], 1 }
 0x463   :  { %2708 = vsyncpa [#allocation7 + $0x1], 1 }
 0x464   :  { %2709 = vsyncpa [#allocation9], 1 }
 0x465   :  { %2710 = vsyncpa [#allocation12], 1 }

</bundles_post_ra>
